<compile_context>
chip_gen: v7x
topology: tpu7x:2x2x1
jax: 0.10.0
libtpu: 0.0.40
codegen_flags: <defaults>
</compile_context>

<pallas_src>
import math
from functools import partial

import jax
import jax.numpy as jnp
from jax.experimental import pallas as pl
from jax.experimental.pallas import tpu as pltpu


_VMEM_LIMIT = 48 * 1024 * 1024  # explicit scoped-VMEM budget, safe on v5e/v6e/v7x


def _pick_tile(dim, preferred, align):
    """Pick a tile for `dim` that always divides it exactly.

    - dim <= preferred (or dim not align-divisible): use the full dim
      (full-extent blocks are always legal).
    - otherwise: smallest multiple-of-`align` divisor >= preferred (capped at
      2*preferred), else the largest divisor <= preferred, else the full dim.
    """
    if dim <= preferred or dim % align != 0:
        return dim
    divisors = [t for t in range(align, dim + 1, align) if dim % t == 0]
    ge = [t for t in divisors if t >= preferred]
    le = [t for t in divisors if t <= preferred]
    if ge and ge[0] <= 2 * preferred:
        return ge[0]
    if le:
        return le[-1]
    return dim


def _apply_activation(acc, activation):
    if activation == "silu":
        return acc * jax.nn.sigmoid(acc)
    if activation == "gelu":  # exact (erf) GELU, matching nn.GELU()
        return 0.5 * acc * (1.0 + jax.lax.erf(acc * (1.0 / math.sqrt(2.0))))
    return acc


# --------------------------------------------------------------------------
# Kernel 1: tiled matmul (+bias, +optional activation, +optional fused residual)
# --------------------------------------------------------------------------

def _matmul_kernel(*refs, nk, activation, has_residual):
    if has_residual:
        x_ref, w_ref, b_ref, r_ref, o_ref, acc_ref = refs
    else:
        x_ref, w_ref, b_ref, o_ref, acc_ref = refs
        r_ref = None
    k = pl.program_id(2)

    @pl.when(k == 0)
    def _init():
        acc_ref[...] = jnp.zeros_like(acc_ref)

    acc_ref[...] += jnp.dot(x_ref[...], w_ref[...],
                            preferred_element_type=jnp.float32)

    @pl.when(k == nk - 1)
    def _finish():
        acc = acc_ref[...] + b_ref[...].astype(jnp.float32)
        acc = _apply_activation(acc, activation)
        if r_ref is not None:
            acc = acc + r_ref[...].astype(jnp.float32)     # residual add in f32
        o_ref[...] = acc.astype(o_ref.dtype)


def matmul_bias(x, w, b, activation="none", residual=None, out_dtype=None,
                tm=512, tn=1024, tk=512):
    """out = act(x @ w + b) [+ residual];  x:(M,K), w:(K,N), b:(N,)."""
    M, K = x.shape
    K2, N = w.shape
    assert K == K2
    out_dtype = out_dtype if out_dtype is not None else x.dtype
    tm = _pick_tile(M, tm, 8)
    tn = _pick_tile(N, tn, 128)
    tk = _pick_tile(K, tk, 128)
    nk = K // tk
    grid = (M // tm, N // tn, nk)

    in_specs = [
        pl.BlockSpec((tm, tk), lambda i, j, k: (i, k)),
        pl.BlockSpec((tk, tn), lambda i, j, k: (k, j)),
        pl.BlockSpec((1, tn), lambda i, j, k: (0, j)),
    ]
    operands = [x, w, b.reshape(1, N)]
    if residual is not None:
        in_specs.append(pl.BlockSpec((tm, tn), lambda i, j, k: (i, j)))
        operands.append(residual)

    bytes_accessed = (x.size * x.dtype.itemsize + w.size * w.dtype.itemsize
                      + N * 4 + M * N * jnp.dtype(out_dtype).itemsize)
    if residual is not None:
        bytes_accessed += residual.size * residual.dtype.itemsize
    cost = pl.CostEstimate(
        flops=2 * M * K * N,
        transcendentals=(M * N if activation != "none" else 0),
        bytes_accessed=int(bytes_accessed))

    return pl.pallas_call(
        partial(_matmul_kernel, nk=nk, activation=activation,
                has_residual=residual is not None),
        grid=grid,
        in_specs=in_specs,
        out_specs=pl.BlockSpec((tm, tn), lambda i, j, k: (i, j)),
        out_shape=jax.ShapeDtypeStruct((M, N), out_dtype),
        scratch_shapes=[pltpu.VMEM((tm, tn), jnp.float32)],
        compiler_params=pltpu.CompilerParams(
            dimension_semantics=("parallel", "parallel", "arbitrary"),
            vmem_limit_bytes=_VMEM_LIMIT),
        cost_estimate=cost,
    )(*operands)


# --------------------------------------------------------------------------
# Kernel 2: patch-embed matmul with the positional-embedding add fused into
# the epilogue:  out[b] = x_patches[b] @ w + bias + pos
# --------------------------------------------------------------------------

def _patch_embed_kernel(x_ref, w_ref, b_ref, pos_ref, o_ref):
    acc = jnp.dot(x_ref[0], w_ref[...], preferred_element_type=jnp.float32)
    acc = acc + b_ref[...].astype(jnp.float32) + pos_ref[...].astype(jnp.float32)
    o_ref[0] = acc.astype(o_ref.dtype)


def patch_embed(x_patches, w, b, pos, out_dtype, tr=512, tn=1024):
    """x_patches:(B,N,Cpp), w:(Cpp,D), b:(D,), pos:(N,D) -> (B,N,D)."""
    B, N, Cpp = x_patches.shape
    Cpp2, D = w.shape
    assert Cpp == Cpp2 and pos.shape == (N, D)
    tr = _pick_tile(N, tr, 8)
    tn = _pick_tile(D, tn, 128)
    grid = (B, N // tr, D // tn)
    return pl.pallas_call(
        _patch_embed_kernel,
        grid=grid,
        in_specs=[
            pl.BlockSpec((1, tr, Cpp), lambda bb, r, j: (bb, r, 0)),
            pl.BlockSpec((Cpp, tn), lambda bb, r, j: (0, j)),
            pl.BlockSpec((1, tn), lambda bb, r, j: (0, j)),
            pl.BlockSpec((tr, tn), lambda bb, r, j: (r, j)),
        ],
        out_specs=pl.BlockSpec((1, tr, tn), lambda bb, r, j: (bb, r, j)),
        out_shape=jax.ShapeDtypeStruct((B, N, D), out_dtype),
        compiler_params=pltpu.CompilerParams(
            dimension_semantics=("parallel", "parallel", "parallel"),
            vmem_limit_bytes=_VMEM_LIMIT),
    )(x_patches, w, b.reshape(1, D), pos)


# --------------------------------------------------------------------------
# Kernel 3: fused (AdaLN / LayerNorm) -> matmul (+bias, +activation)
#   out[b] = act( (LN(x[b]) * gamma[b] + beta[b]) @ w + bias )
# The normalized+modulated (tr, D) block is computed once per row block
# (cached in a VMEM scratch under @pl.when(j == 0)) and reused for every
# output tile j; the Nout axis is innermost and "arbitrary".
# --------------------------------------------------------------------------

def _norm_matmul_kernel(x_ref, g_ref, bt_ref, w_ref, b_ref, o_ref, h_ref, *,
                        eps, activation):
    @pl.when(pl.program_id(2) == 0)
    def _prologue():
        x = x_ref[0].astype(jnp.float32)                       # (tr, D)
        mean = jnp.mean(x, axis=-1, keepdims=True)
        var = jnp.mean((x - mean) ** 2, axis=-1, keepdims=True)
        xn = (x - mean) * jax.lax.rsqrt(var + eps)
        g = g_ref[0].astype(jnp.float32)                       # (1, D)
        bt = bt_ref[0].astype(jnp.float32)                     # (1, D)
        h_ref[...] = (g * xn + bt).astype(h_ref.dtype)         # cached, MXU dtype

    acc = jnp.dot(h_ref[...], w_ref[...], preferred_element_type=jnp.float32)
    acc = acc + b_ref[...].astype(jnp.float32)
    acc = _apply_activation(acc, activation)
    o_ref[0] = acc.astype(o_ref.dtype)


def norm_modulate_matmul(x, gamma, beta, w, b, *, eps, activation="none",
                         out_dtype=None, tr=512, tn=1024):
    """x:(B,N,D), gamma/beta:(B,D), w:(D,Nout), b:(Nout,) -> (B,N,Nout)."""
    B, N, D = x.shape
    D2, Nout = w.shape
    assert D == D2
    out_dtype = out_dtype if out_dtype is not None else x.dtype
    tr = _pick_tile(N, tr, 8)
    tn = _pick_tile(Nout, tn, 128)
    grid = (B, N // tr, Nout // tn)

    gamma = gamma.reshape(B, 1, D).astype(jnp.float32)
    beta = beta.reshape(B, 1, D).astype(jnp.float32)

    cost = pl.CostEstimate(
        flops=2 * B * N * D * Nout,
        transcendentals=B * N * (1 + (Nout if activation != "none" else 0)),
        bytes_accessed=int(x.size * x.dtype.itemsize + w.size * w.dtype.itemsize
                           + B * N * Nout * jnp.dtype(out_dtype).itemsize))

    return pl.pallas_call(
        partial(_norm_matmul_kernel, eps=eps, activation=activation),
        grid=grid,
        in_specs=[
            pl.BlockSpec((1, tr, D), lambda bb, r, j: (bb, r, 0)),
            pl.BlockSpec((1, 1, D), lambda bb, r, j: (bb, 0, 0)),
            pl.BlockSpec((1, 1, D), lambda bb, r, j: (bb, 0, 0)),
            pl.BlockSpec((D, tn), lambda bb, r, j: (0, j)),
            pl.BlockSpec((1, tn), lambda bb, r, j: (0, j)),
        ],
        out_specs=pl.BlockSpec((1, tr, tn), lambda bb, r, j: (bb, r, j)),
        out_shape=jax.ShapeDtypeStruct((B, N, Nout), out_dtype),
        scratch_shapes=[pltpu.VMEM((tr, D), w.dtype)],
        compiler_params=pltpu.CompilerParams(
            dimension_semantics=("parallel", "parallel", "arbitrary"),
            vmem_limit_bytes=_VMEM_LIMIT),
        cost_estimate=cost,
    )(x, gamma, beta, w, b.reshape(1, Nout))


# --------------------------------------------------------------------------
# Kernel 4: multi-head attention.
#   qkv is head-split once in XLA into a (3*B*heads, N, hd) layout; the kernel
#   grids over (B, heads, q_tiles) — no per-head unroll, no unaligned lane
#   slices, bounded per-step VMEM (q tile + full K/V of one head), >=2
#   parallel axes for v7x megacore. The 1/sqrt(hd) scale is folded into q.
# --------------------------------------------------------------------------

def _attn_kernel(q_ref, k_ref, v_ref, o_ref, *, scale):
    q = q_ref[0] * scale                                       # (tq, hd)
    k = k_ref[0]                                               # (N, hd)
    v = v_ref[0]                                               # (N, hd)
    s = jax.lax.dot_general(q, k, (((1,), (1,)), ((), ())),
                            preferred_element_type=jnp.float32)   # (tq, N)
    s = s - jnp.max(s, axis=-1, keepdims=True)
    p = jnp.exp(s)
    p = p * pl.reciprocal(jnp.sum(p, axis=-1, keepdims=True), approx=True)
    o = jnp.dot(p.astype(v.dtype), v, preferred_element_type=jnp.float32)
    o_ref[0] = o.astype(o_ref.dtype)


def multihead_attention(qkv_h, B, heads, scale, out_dtype, tq=256):
    """qkv_h: (3*B*heads, N, hd) head-split [q|k|v] -> (B*heads, N, hd)."""
    BH3, N, hd = qkv_h.shape
    assert BH3 == 3 * B * heads
    tq = _pick_tile(N, tq, 8)
    grid = (B, heads, N // tq)
    # TODO(synk): for very long sequences add online-softmax tiling over K as well.
    cost = pl.CostEstimate(
        flops=4 * B * heads * N * N * hd,
        transcendentals=B * heads * N * N,
        bytes_accessed=int(qkv_h.size * qkv_h.dtype.itemsize
                           + B * heads * N * hd * jnp.dtype(out_dtype).itemsize))
    return pl.pallas_call(
        partial(_attn_kernel, scale=scale),
        grid=grid,
        in_specs=[
            pl.BlockSpec((1, tq, hd), lambda b, h, qi: (b * heads + h, qi, 0)),
            pl.BlockSpec((1, N, hd),
                         lambda b, h, qi: (B * heads + b * heads + h, 0, 0)),
            pl.BlockSpec((1, N, hd),
                         lambda b, h, qi: (2 * B * heads + b * heads + h, 0, 0)),
        ],
        out_specs=pl.BlockSpec((1, tq, hd), lambda b, h, qi: (b * heads + h, qi, 0)),
        out_shape=jax.ShapeDtypeStruct((B * heads, N, hd), out_dtype),
        compiler_params=pltpu.CompilerParams(
            dimension_semantics=("parallel", "parallel", "parallel"),
            vmem_limit_bytes=_VMEM_LIMIT),
        cost_estimate=cost,
    )(qkv_h, qkv_h, qkv_h)


# --------------------------------------------------------------------------
# Kernel 5: out_proj consuming the per-head attention layout directly.
#   out[b,n,:] = sum_h attn[b,h,n,:] @ W_o[h*hd:(h+1)*hd, :] + bias + residual
# Reduction grid axis over heads with an f32 accumulator; no transpose back.
# --------------------------------------------------------------------------

def _headsum_matmul_kernel(x_ref, w_ref, b_ref, r_ref, o_ref, acc_ref, *, nh):
    h = pl.program_id(3)

    @pl.when(h == 0)
    def _init():
        acc_ref[...] = jnp.zeros_like(acc_ref)

    acc_ref[...] += jnp.dot(x_ref[0], w_ref[...],
                            preferred_element_type=jnp.float32)

    @pl.when(h == nh - 1)
    def _finish():
        acc = (acc_ref[...] + b_ref[...].astype(jnp.float32)
               + r_ref[0].astype(jnp.float32))
        o_ref[0] = acc.astype(o_ref.dtype)


def headsum_matmul_residual(x, heads, w, b, residual, out_dtype=None,
                            tr=512, tn=1024):
    """x:(B*heads,N,hd), w:(D,D) (rows in head order), residual:(B,N,D)."""
    BH, N, hd = x.shape
    B = BH // heads
    D, D2 = w.shape
    assert D == D2 and heads * hd == D and hd % 8 == 0
    out_dtype = out_dtype if out_dtype is not None else residual.dtype
    tr = _pick_tile(N, tr, 8)
    tn = _pick_tile(D, tn, 128)
    grid = (B, N // tr, D // tn, heads)

    return pl.pallas_call(
        partial(_headsum_matmul_kernel, nh=heads),
        grid=grid,
        in_specs=[
            pl.BlockSpec((1, tr, hd), lambda bb, r, j, h: (bb * heads + h, r, 0)),
            pl.BlockSpec((hd, tn), lambda bb, r, j, h: (h, j)),
            pl.BlockSpec((1, tn), lambda bb, r, j, h: (0, j)),
            pl.BlockSpec((1, tr, tn), lambda bb, r, j, h: (bb, r, j)),
        ],
        out_specs=pl.BlockSpec((1, tr, tn), lambda bb, r, j, h: (bb, r, j)),
        out_shape=jax.ShapeDtypeStruct((B, N, D), out_dtype),
        scratch_shapes=[pltpu.VMEM((tr, tn), jnp.float32)],
        compiler_params=pltpu.CompilerParams(
            dimension_semantics=("parallel", "parallel", "parallel", "arbitrary"),
            vmem_limit_bytes=_VMEM_LIMIT),
    )(x, w, b.reshape(1, D), residual)


# --------------------------------------------------------------------------
# Glue (plain JAX): reshapes, parameter setup, sinusoidal embedding
# --------------------------------------------------------------------------

def sinusoidal_embedding(t, dim):
    half = dim // 2
    freqs = jnp.exp(-math.log(10000.0) * jnp.arange(half, dtype=jnp.float32) / half)
    args = t.astype(jnp.float32)[:, None] * freqs[None, :]
    return jnp.concatenate([jnp.sin(args), jnp.cos(args)], axis=1)


def init_params(key, *, img_size, patch, in_ch, dim, depth, heads, out_ch,
                param_dtype=jnp.bfloat16):
    """Weight matrices in bf16 (MXU operands); biases / norm params in f32."""
    num_patches = (img_size // patch) ** 2
    mlp_hidden = dim * 4

    def rn(k, shape, scale=0.02, dtype=param_dtype):
        return (jax.random.normal(k, shape, dtype=jnp.float32) * scale).astype(dtype)

    keys = iter(jax.random.split(key, 16 + depth * 16))
    params = {
        # Conv2d(in_ch, dim, k=patch, s=patch) == matmul on flattened patches.
        "patch_w": rn(next(keys), (in_ch * patch * patch, dim)),
        "patch_b": rn(next(keys), (dim,), dtype=jnp.float32),
        "pos_emb": rn(next(keys), (1, num_patches, dim)),
        "time_w1": rn(next(keys), (dim, mlp_hidden)),
        "time_b1": rn(next(keys), (mlp_hidden,), dtype=jnp.float32),
        "time_w2": rn(next(keys), (mlp_hidden, dim)),
        "time_b2": rn(next(keys), (dim,), dtype=jnp.float32),
        "norm_w": jnp.ones((dim,), jnp.float32),
        "norm_b": jnp.zeros((dim,), jnp.float32),
        # ConvTranspose2d(dim, out_ch, k=patch, s=patch) weight (dim, out_ch*p*p)
        "unpatch_w": rn(next(keys), (dim, out_ch * patch * patch)),
        "unpatch_b": rn(next(keys), (out_ch,), dtype=jnp.float32),
        "blocks": [],
    }
    for _ in range(depth):
        blk = {
            # AdaLN-Zero: zero-initialized exactly like nn.init.zeros_ in the reference.
            "ada_w": jnp.zeros((dim, dim * 4), param_dtype),
            "ada_b": jnp.zeros((dim * 4,), jnp.float32),
            "in_proj_w": rn(next(keys), (dim, 3 * dim)),   # columns = [q | k | v]
            "in_proj_b": rn(next(keys), (3 * dim,), dtype=jnp.float32),
            "out_proj_w": rn(next(keys), (dim, dim)),       # rows in head order
            "out_proj_b": rn(next(keys), (dim,), dtype=jnp.float32),
            "mlp_w1": rn(next(keys), (dim, mlp_hidden)),
            "mlp_b1": rn(next(keys), (mlp_hidden,), dtype=jnp.float32),
            "mlp_w2": rn(next(keys), (mlp_hidden, dim)),
            "mlp_b2": rn(next(keys), (dim,), dtype=jnp.float32),
        }
        params["blocks"].append(blk)
    return params


def dit_forward(params, x, t, *, patch, heads):
    B, C, H, W = x.shape
    p = patch
    Hp, Wp = H // p, W // p
    N = Hp * Wp
    D = params["pos_emb"].shape[-1]
    assert D % heads == 0
    hd = D // heads
    scale = 1.0 / math.sqrt(hd)
    cdt = params["patch_w"].dtype          # bf16 compute dtype for MXU operands

    # ---- PatchEmbed (strided conv == per-patch matmul) + pos-emb, fused ----
    patches = (x.reshape(B, C, Hp, p, Wp, p)
                 .transpose(0, 2, 4, 1, 3, 5)
                 .reshape(B, N, C * p * p)).astype(cdt)
    tok = patch_embed(patches, params["patch_w"], params["patch_b"],
                      params["pos_emb"][0], out_dtype=cdt)            # (B, N, D)

    # ---- TimeEmbedding MLP ----
    t_sin = sinusoidal_embedding(t, D).astype(cdt)                    # (B, D)
    h1 = matmul_bias(t_sin, params["time_w1"], params["time_b1"],
                     activation="silu", out_dtype=cdt)
    t_emb = matmul_bias(h1, params["time_w2"], params["time_b2"], out_dtype=cdt)

    # ---- Transformer blocks ----
    for blk in params["blocks"]:
        gb = matmul_bias(t_emb, blk["ada_w"], blk["ada_b"],
                         out_dtype=jnp.float32)                        # (B, 4D)
        g1, b1, g2, b2 = jnp.split(gb, 4, axis=-1)

        # attention branch: AdaLN fused into the qkv-projection prologue
        qkv = norm_modulate_matmul(tok, g1, b1,
                                   blk["in_proj_w"], blk["in_proj_b"],
                                   eps=1e-6, out_dtype=cdt)            # (B, N, 3D)
        # head-split once (layout glue in XLA) -> (3*B*heads, N, hd)
        qkv_h = (qkv.reshape(B, N, 3, heads, hd)
                    .transpose(2, 0, 3, 1, 4)
                    .reshape(3 * B * heads, N, hd))
        attn = multihead_attention(qkv_h, B, heads, scale,
                                   out_dtype=cdt)                      # (B*heads, N, hd)
        # out_proj consumes per-head layout; residual fused into epilogue
        tok = headsum_matmul_residual(attn, heads,
                                      blk["out_proj_w"], blk["out_proj_b"],
                                      tok, out_dtype=cdt)              # (B, N, D)

        # MLP branch: AdaLN fused into mlp1 (+GELU), residual fused into mlp2
        hmid = norm_modulate_matmul(tok, g2, b2,
                                    blk["mlp_w1"], blk["mlp_b1"],
                                    eps=1e-6, activation="gelu",
                                    out_dtype=cdt)                     # (B, N, 4D)
        tok = matmul_bias(hmid.reshape(B * N, 4 * D), blk["mlp_w2"], blk["mlp_b2"],
                          residual=tok.reshape(B * N, D),
                          out_dtype=cdt).reshape(B, N, D)

    # ---- Final LayerNorm fused into the unpatch (ConvTranspose) matmul ----
    out_ch = params["unpatch_b"].shape[0]
    gamma_ln = jnp.broadcast_to(params["norm_w"][None, :], (B, D))
    beta_ln = jnp.broadcast_to(params["norm_b"][None, :], (B, D))
    bias_flat = jnp.repeat(params["unpatch_b"], p * p)                 # (out_ch*p*p,)
    # TODO(synk): out_ch*p*p < 128 makes this final write a masked-lane store; a
    # tokens-on-lanes (transposed) layout would make it lane-dense.
    y = norm_modulate_matmul(tok, gamma_ln, beta_ln,
                             params["unpatch_w"], bias_flat,
                             eps=1e-5, out_dtype=jnp.float32)          # (B, N, out_ch*p*p)
    # pixel-shuffle back to NCHW (pure layout glue, stays in XLA)
    y = (y.reshape(B, Hp, Wp, out_ch, p, p)
           .transpose(0, 3, 1, 4, 2, 5)
           .reshape(B, out_ch, H, W))
    return y


# --------------------------------------------------------------------------
if __name__ == "__main__":
    # Small config consistent with the module (dim divisible by heads; img % patch == 0)
    img_size, patch, in_ch, dim, depth, heads, out_ch = 16, 4, 3, 32, 2, 4, 2
    B = 2

    key = jax.random.PRNGKey(0)
    k_param, k_x, k_t = jax.random.split(key, 3)

    params = init_params(k_param, img_size=img_size, patch=patch, in_ch=in_ch,
                         dim=dim, depth=depth, heads=heads, out_ch=out_ch)

    x = jax.random.normal(k_x, (B, in_ch, img_size, img_size), dtype=jnp.float32)
    t = jax.random.randint(k_t, (B,), 0, 1000)

    fwd = jax.jit(partial(dit_forward, patch=patch, heads=heads))
    out = fwd(params, x, t)
    out = jax.block_until_ready(out)

    assert out.shape == (B, out_ch, img_size, img_size), out.shape
    assert bool(jnp.all(jnp.isfinite(out)))
    print("KERNEL_OK")
</pallas_src>

<mosaic_0001>
module attributes {stable_mosaic.version = 11 : i64} {
  func.func @_matmul_kernel(%arg0: i32, %arg1: i32, %arg2: i32, %arg3: memref<2x32xbf16, #tpu.memory_space<vmem>>, %arg4: memref<32x128xbf16, #tpu.memory_space<vmem>>, %arg5: memref<1x128xf32, #tpu.memory_space<vmem>>, %arg6: memref<2x128xbf16, #tpu.memory_space<vmem>>, %arg7: memref<2x128xf32, #tpu.memory_space<vmem>>) attributes {dimension_semantics = [#tpu.dimension_semantics<parallel>, #tpu.dimension_semantics<parallel>, #tpu.dimension_semantics<arbitrary>], iteration_bounds = array<i64: 1, 1, 1>, scalar_prefetch = 0 : i64, scratch_operands = 1 : i64, tpu.core_type = #tpu.core_type<tc>, window_params = [{transform_indices = @transform_0, window_bounds = array<i64: 2, 32>}, {transform_indices = @transform_1, window_bounds = array<i64: 32, 128>}, {transform_indices = @transform_2, window_bounds = array<i64: 1, 128>}, {transform_indices = @transform_3, window_bounds = array<i64: 2, 128>}]} {
    %c0_i32 = arith.constant 0 : i32
    %0 = arith.cmpi eq, %arg2, %c0_i32 : i32
    %1 = arith.extui %0 : i1 to i32
    %c0_i32_0 = arith.constant 0 : i32
    %2 = arith.cmpi ne, %1, %c0_i32_0 : i32
    scf.if %2 {
      %cst_10 = arith.constant 0.000000e+00 : f32
      %12 = vector.broadcast %cst_10 : f32 to vector<2x128xf32>
      %c0_11 = arith.constant 0 : index
      %c0_12 = arith.constant 0 : index
      %13 = vector.load %arg7[%c0_11, %c0_12] : memref<2x128xf32, #tpu.memory_space<vmem>>, vector<2x128xf32>
      tpu.vector_store %arg7[%c0_11, %c0_12], %12 {strides = array<i32>} : memref<2x128xf32, #tpu.memory_space<vmem>>, vector<2x128xf32>,
    } else {
    }
    %c0 = arith.constant 0 : index
    %c0_1 = arith.constant 0 : index
    %3 = vector.load %arg7[%c0, %c0_1] : memref<2x128xf32, #tpu.memory_space<vmem>>, vector<2x128xf32>
    %c0_2 = arith.constant 0 : index
    %c0_3 = arith.constant 0 : index
    %4 = vector.load %arg3[%c0_2, %c0_3] : memref<2x32xbf16, #tpu.memory_space<vmem>>, vector<2x32xbf16>
    %c0_4 = arith.constant 0 : index
    %c0_5 = arith.constant 0 : index
    %5 = vector.load %arg4[%c0_4, %c0_5] : memref<32x128xbf16, #tpu.memory_space<vmem>>, vector<32x128xbf16>
    %cst = arith.constant dense<0.000000e+00> : vector<2x128xf32>
    %6 = tpu.matmul %4, %5, %cst {dimension_numbers = #tpu.dot_dimension_numbers<[1], [0], [0], [1], [0, 0, 1, 1], [], []>} : vector<2x32xbf16>, vector<32x128xbf16>, vector<2x128xf32> -> vector<2x128xf32>
    %7 = arith.addf %3, %6 : vector<2x128xf32>
    %c0_6 = arith.constant 0 : index
    %c0_7 = arith.constant 0 : index
    %8 = vector.load %arg7[%c0_6, %c0_7] : memref<2x128xf32, #tpu.memory_space<vmem>>, vector<2x128xf32>
    tpu.vector_store %arg7[%c0_6, %c0_7], %7 {strides = array<i32>} : memref<2x128xf32, #tpu.memory_space<vmem>>, vector<2x128xf32>,
    %c0_i32_8 = arith.constant 0 : i32
    %9 = arith.cmpi eq, %arg2, %c0_i32_8 : i32
    %10 = arith.extui %9 : i1 to i32
    %c0_i32_9 = arith.constant 0 : i32
    %11 = arith.cmpi ne, %10, %c0_i32_9 : i32
    scf.if %11 {
      %c0_10 = arith.constant 0 : index
      %c0_11 = arith.constant 0 : index
      %12 = vector.load %arg7[%c0_10, %c0_11] : memref<2x128xf32, #tpu.memory_space<vmem>>, vector<2x128xf32>
      %c0_12 = arith.constant 0 : index
      %c0_13 = arith.constant 0 : index
      %13 = vector.load %arg5[%c0_12, %c0_13] : memref<1x128xf32, #tpu.memory_space<vmem>>, vector<1x128xf32>
      %14 = vector.broadcast %13 : vector<1x128xf32> to vector<2x128xf32>
      %15 = arith.addf %12, %14 : vector<2x128xf32>
      %16 = arith.negf %15 : vector<2x128xf32>
      %17 = math.exp %16 : vector<2x128xf32>
      %cst_14 = arith.constant 1.000000e+00 : f32
      %18 = vector.broadcast %cst_14 : f32 to vector<2x128xf32>
      %19 = arith.addf %18, %17 : vector<2x128xf32>
      %20 = arith.divf %18, %19 : vector<2x128xf32>
      %21 = arith.mulf %15, %20 : vector<2x128xf32>
      %22 = arith.truncf %21 : vector<2x128xf32> to vector<2x128xbf16>
      %c0_15 = arith.constant 0 : index
      %c0_16 = arith.constant 0 : index
      %23 = vector.load %arg6[%c0_15, %c0_16] : memref<2x128xbf16, #tpu.memory_space<vmem>>, vector<2x128xbf16>
      tpu.vector_store %arg6[%c0_15, %c0_16], %22 {strides = array<i32>} : memref<2x128xbf16, #tpu.memory_space<vmem>>, vector<2x128xbf16>,
    } else {
    }
    return
  }
  func.func @transform_0(%arg0: i32, %arg1: i32, %arg2: i32) -> (i32, i32) {
    %c0_i32 = arith.constant 0 : i32
    return %arg0, %arg2 : i32, i32
  }
  func.func @transform_1(%arg0: i32, %arg1: i32, %arg2: i32) -> (i32, i32) {
    %c0_i32 = arith.constant 0 : i32
    return %arg2, %arg1 : i32, i32
  }
  func.func @transform_2(%arg0: i32, %arg1: i32, %arg2: i32) -> (i32, i32) {
    %c0_i32 = arith.constant 0 : i32
    %c0_i32_0 = arith.constant 0 : i32
    return %c0_i32, %arg1 : i32, i32
  }
  func.func @transform_3(%arg0: i32, %arg1: i32, %arg2: i32) -> (i32, i32) {
    %c0_i32 = arith.constant 0 : i32
    return %arg0, %arg1 : i32, i32
  }
}

module attributes {stable_mosaic.version = 11 : i64} {
  func.func @_matmul_kernel(%arg0: i32, %arg1: i32, %arg2: i32, %arg3: memref<2x128xbf16, #tpu.memory_space<vmem>>, %arg4: memref<128x32xbf16, #tpu.memory_space<vmem>>, %arg5: memref<1x32xf32, #tpu.memory_space<vmem>>, %arg6: memref<2x32xbf16, #tpu.memory_space<vmem>>, %arg7: memref<2x32xf32, #tpu.memory_space<vmem>>) attributes {dimension_semantics = [#tpu.dimension_semantics<parallel>, #tpu.dimension_semantics<parallel>, #tpu.dimension_semantics<arbitrary>], iteration_bounds = array<i64: 1, 1, 1>, scalar_prefetch = 0 : i64, scratch_operands = 1 : i64, tpu.core_type = #tpu.core_type<tc>, window_params = [{transform_indices = @transform_0, window_bounds = array<i64: 2, 128>}, {transform_indices = @transform_1, window_bounds = array<i64: 128, 32>}, {transform_indices = @transform_2, window_bounds = array<i64: 1, 32>}, {transform_indices = @transform_3, window_bounds = array<i64: 2, 32>}]} {
    %c0_i32 = arith.constant 0 : i32
    %0 = arith.cmpi eq, %arg2, %c0_i32 : i32
    %1 = arith.extui %0 : i1 to i32
    %c0_i32_0 = arith.constant 0 : i32
    %2 = arith.cmpi ne, %1, %c0_i32_0 : i32
    scf.if %2 {
      %cst_10 = arith.constant 0.000000e+00 : f32
      %12 = vector.broadcast %cst_10 : f32 to vector<2x32xf32>
      %c0_11 = arith.constant 0 : index
      %c0_12 = arith.constant 0 : index
      %13 = vector.load %arg7[%c0_11, %c0_12] : memref<2x32xf32, #tpu.memory_space<vmem>>, vector<2x32xf32>
      tpu.vector_store %arg7[%c0_11, %c0_12], %12 {strides = array<i32>} : memref<2x32xf32, #tpu.memory_space<vmem>>, vector<2x32xf32>,
    } else {
    }
    %c0 = arith.constant 0 : index
    %c0_1 = arith.constant 0 : index
    %3 = vector.load %arg7[%c0, %c0_1] : memref<2x32xf32, #tpu.memory_space<vmem>>, vector<2x32xf32>
    %c0_2 = arith.constant 0 : index
    %c0_3 = arith.constant 0 : index
    %4 = vector.load %arg3[%c0_2, %c0_3] : memref<2x128xbf16, #tpu.memory_space<vmem>>, vector<2x128xbf16>
    %c0_4 = arith.constant 0 : index
    %c0_5 = arith.constant 0 : index
    %5 = vector.load %arg4[%c0_4, %c0_5] : memref<128x32xbf16, #tpu.memory_space<vmem>>, vector<128x32xbf16>
    %cst = arith.constant dense<0.000000e+00> : vector<2x32xf32>
    %6 = tpu.matmul %4, %5, %cst {dimension_numbers = #tpu.dot_dimension_numbers<[1], [0], [0], [1], [0, 0, 1, 1], [], []>} : vector<2x128xbf16>, vector<128x32xbf16>, vector<2x32xf32> -> vector<2x32xf32>
    %7 = arith.addf %3, %6 : vector<2x32xf32>
    %c0_6 = arith.constant 0 : index
    %c0_7 = arith.constant 0 : index
    %8 = vector.load %arg7[%c0_6, %c0_7] : memref<2x32xf32, #tpu.memory_space<vmem>>, vector<2x32xf32>
    tpu.vector_store %arg7[%c0_6, %c0_7], %7 {strides = array<i32>} : memref<2x32xf32, #tpu.memory_space<vmem>>, vector<2x32xf32>,
    %c0_i32_8 = arith.constant 0 : i32
    %9 = arith.cmpi eq, %arg2, %c0_i32_8 : i32
    %10 = arith.extui %9 : i1 to i32
    %c0_i32_9 = arith.constant 0 : i32
    %11 = arith.cmpi ne, %10, %c0_i32_9 : i32
    scf.if %11 {
      %c0_10 = arith.constant 0 : index
      %c0_11 = arith.constant 0 : index
      %12 = vector.load %arg7[%c0_10, %c0_11] : memref<2x32xf32, #tpu.memory_space<vmem>>, vector<2x32xf32>
      %c0_12 = arith.constant 0 : index
      %c0_13 = arith.constant 0 : index
      %13 = vector.load %arg5[%c0_12, %c0_13] : memref<1x32xf32, #tpu.memory_space<vmem>>, vector<1x32xf32>
      %14 = vector.broadcast %13 : vector<1x32xf32> to vector<2x32xf32>
      %15 = arith.addf %12, %14 : vector<2x32xf32>
      %16 = arith.truncf %15 : vector<2x32xf32> to vector<2x32xbf16>
      %c0_14 = arith.constant 0 : index
      %c0_15 = arith.constant 0 : index
      %17 = vector.load %arg6[%c0_14, %c0_15] : memref<2x32xbf16, #tpu.memory_space<vmem>>, vector<2x32xbf16>
      tpu.vector_store %arg6[%c0_14, %c0_15], %16 {strides = array<i32>} : memref<2x32xbf16, #tpu.memory_space<vmem>>, vector<2x32xbf16>,
    } else {
    }
    return
  }
  func.func @transform_0(%arg0: i32, %arg1: i32, %arg2: i32) -> (i32, i32) {
    %c0_i32 = arith.constant 0 : i32
    return %arg0, %arg2 : i32, i32
  }
  func.func @transform_1(%arg0: i32, %arg1: i32, %arg2: i32) -> (i32, i32) {
    %c0_i32 = arith.constant 0 : i32
    return %arg2, %arg1 : i32, i32
  }
  func.func @transform_2(%arg0: i32, %arg1: i32, %arg2: i32) -> (i32, i32) {
    %c0_i32 = arith.constant 0 : i32
    %c0_i32_0 = arith.constant 0 : i32
    return %c0_i32, %arg1 : i32, i32
  }
  func.func @transform_3(%arg0: i32, %arg1: i32, %arg2: i32) -> (i32, i32) {
    %c0_i32 = arith.constant 0 : i32
    return %arg0, %arg1 : i32, i32
  }
}

module attributes {stable_mosaic.version = 11 : i64} {
  func.func @_matmul_kernel(%arg0: i32, %arg1: i32, %arg2: i32, %arg3: memref<2x32xbf16, #tpu.memory_space<vmem>>, %arg4: memref<32x128xbf16, #tpu.memory_space<vmem>>, %arg5: memref<1x128xf32, #tpu.memory_space<vmem>>, %arg6: memref<2x128xf32, #tpu.memory_space<vmem>>, %arg7: memref<2x128xf32, #tpu.memory_space<vmem>>) attributes {dimension_semantics = [#tpu.dimension_semantics<parallel>, #tpu.dimension_semantics<parallel>, #tpu.dimension_semantics<arbitrary>], iteration_bounds = array<i64: 1, 1, 1>, scalar_prefetch = 0 : i64, scratch_operands = 1 : i64, tpu.core_type = #tpu.core_type<tc>, window_params = [{transform_indices = @transform_0, window_bounds = array<i64: 2, 32>}, {transform_indices = @transform_1, window_bounds = array<i64: 32, 128>}, {transform_indices = @transform_2, window_bounds = array<i64: 1, 128>}, {transform_indices = @transform_3, window_bounds = array<i64: 2, 128>}]} {
    %c0_i32 = arith.constant 0 : i32
    %0 = arith.cmpi eq, %arg2, %c0_i32 : i32
    %1 = arith.extui %0 : i1 to i32
    %c0_i32_0 = arith.constant 0 : i32
    %2 = arith.cmpi ne, %1, %c0_i32_0 : i32
    scf.if %2 {
      %cst_10 = arith.constant 0.000000e+00 : f32
      %12 = vector.broadcast %cst_10 : f32 to vector<2x128xf32>
      %c0_11 = arith.constant 0 : index
      %c0_12 = arith.constant 0 : index
      %13 = vector.load %arg7[%c0_11, %c0_12] : memref<2x128xf32, #tpu.memory_space<vmem>>, vector<2x128xf32>
      tpu.vector_store %arg7[%c0_11, %c0_12], %12 {strides = array<i32>} : memref<2x128xf32, #tpu.memory_space<vmem>>, vector<2x128xf32>,
    } else {
    }
    %c0 = arith.constant 0 : index
    %c0_1 = arith.constant 0 : index
    %3 = vector.load %arg7[%c0, %c0_1] : memref<2x128xf32, #tpu.memory_space<vmem>>, vector<2x128xf32>
    %c0_2 = arith.constant 0 : index
    %c0_3 = arith.constant 0 : index
    %4 = vector.load %arg3[%c0_2, %c0_3] : memref<2x32xbf16, #tpu.memory_space<vmem>>, vector<2x32xbf16>
    %c0_4 = arith.constant 0 : index
    %c0_5 = arith.constant 0 : index
    %5 = vector.load %arg4[%c0_4, %c0_5] : memref<32x128xbf16, #tpu.memory_space<vmem>>, vector<32x128xbf16>
    %cst = arith.constant dense<0.000000e+00> : vector<2x128xf32>
    %6 = tpu.matmul %4, %5, %cst {dimension_numbers = #tpu.dot_dimension_numbers<[1], [0], [0], [1], [0, 0, 1, 1], [], []>} : vector<2x32xbf16>, vector<32x128xbf16>, vector<2x128xf32> -> vector<2x128xf32>
    %7 = arith.addf %3, %6 : vector<2x128xf32>
    %c0_6 = arith.constant 0 : index
    %c0_7 = arith.constant 0 : index
    %8 = vector.load %arg7[%c0_6, %c0_7] : memref<2x128xf32, #tpu.memory_space<vmem>>, vector<2x128xf32>
    tpu.vector_store %arg7[%c0_6, %c0_7], %7 {strides = array<i32>} : memref<2x128xf32, #tpu.memory_space<vmem>>, vector<2x128xf32>,
    %c0_i32_8 = arith.constant 0 : i32
    %9 = arith.cmpi eq, %arg2, %c0_i32_8 : i32
    %10 = arith.extui %9 : i1 to i32
    %c0_i32_9 = arith.constant 0 : i32
    %11 = arith.cmpi ne, %10, %c0_i32_9 : i32
    scf.if %11 {
      %c0_10 = arith.constant 0 : index
      %c0_11 = arith.constant 0 : index
      %12 = vector.load %arg7[%c0_10, %c0_11] : memref<2x128xf32, #tpu.memory_space<vmem>>, vector<2x128xf32>
      %c0_12 = arith.constant 0 : index
      %c0_13 = arith.constant 0 : index
      %13 = vector.load %arg5[%c0_12, %c0_13] : memref<1x128xf32, #tpu.memory_space<vmem>>, vector<1x128xf32>
      %14 = vector.broadcast %13 : vector<1x128xf32> to vector<2x128xf32>
      %15 = arith.addf %12, %14 : vector<2x128xf32>
      %c0_14 = arith.constant 0 : index
      %c0_15 = arith.constant 0 : index
      %16 = vector.load %arg6[%c0_14, %c0_15] : memref<2x128xf32, #tpu.memory_space<vmem>>, vector<2x128xf32>
      tpu.vector_store %arg6[%c0_14, %c0_15], %15 {strides = array<i32>} : memref<2x128xf32, #tpu.memory_space<vmem>>, vector<2x128xf32>,
    } else {
    }
    return
  }
  func.func @transform_0(%arg0: i32, %arg1: i32, %arg2: i32) -> (i32, i32) {
    %c0_i32 = arith.constant 0 : i32
    return %arg0, %arg2 : i32, i32
  }
  func.func @transform_1(%arg0: i32, %arg1: i32, %arg2: i32) -> (i32, i32) {
    %c0_i32 = arith.constant 0 : i32
    return %arg2, %arg1 : i32, i32
  }
  func.func @transform_2(%arg0: i32, %arg1: i32, %arg2: i32) -> (i32, i32) {
    %c0_i32 = arith.constant 0 : i32
    %c0_i32_0 = arith.constant 0 : i32
    return %c0_i32, %arg1 : i32, i32
  }
  func.func @transform_3(%arg0: i32, %arg1: i32, %arg2: i32) -> (i32, i32) {
    %c0_i32 = arith.constant 0 : i32
    return %arg0, %arg1 : i32, i32
  }
}

module attributes {stable_mosaic.version = 11 : i64} {
  func.func @_patch_embed_kernel(%arg0: i32, %arg1: i32, %arg2: i32, %arg3: memref<1x16x48xbf16, #tpu.memory_space<vmem>>, %arg4: memref<48x32xbf16, #tpu.memory_space<vmem>>, %arg5: memref<1x32xf32, #tpu.memory_space<vmem>>, %arg6: memref<16x32xbf16, #tpu.memory_space<vmem>>, %arg7: memref<1x16x32xbf16, #tpu.memory_space<vmem>>) attributes {dimension_semantics = [#tpu.dimension_semantics<parallel>, #tpu.dimension_semantics<parallel>, #tpu.dimension_semantics<parallel>], iteration_bounds = array<i64: 2, 1, 1>, scalar_prefetch = 0 : i64, scratch_operands = 0 : i64, tpu.core_type = #tpu.core_type<tc>, window_params = [{transform_indices = @transform_0, window_bounds = array<i64: 1, 16, 48>}, {transform_indices = @transform_1, window_bounds = array<i64: 48, 32>}, {transform_indices = @transform_2, window_bounds = array<i64: 1, 32>}, {transform_indices = @transform_3, window_bounds = array<i64: 16, 32>}, {transform_indices = @transform_4, window_bounds = array<i64: 1, 16, 32>}]} {
    %c0 = arith.constant 0 : index
    %c0_0 = arith.constant 0 : index
    %c0_1 = arith.constant 0 : index
    %0 = vector.load %arg3[%c0, %c0_0, %c0_1] : memref<1x16x48xbf16, #tpu.memory_space<vmem>>, vector<1x16x48xbf16>
    %1 = vector.shape_cast %0 : vector<1x16x48xbf16> to vector<16x48xbf16>
    %c0_2 = arith.constant 0 : index
    %c0_3 = arith.constant 0 : index
    %2 = vector.load %arg4[%c0_2, %c0_3] : memref<48x32xbf16, #tpu.memory_space<vmem>>, vector<48x32xbf16>
    %cst = arith.constant dense<0.000000e+00> : vector<16x32xf32>
    %3 = tpu.matmul %1, %2, %cst {dimension_numbers = #tpu.dot_dimension_numbers<[1], [0], [0], [1], [0, 0, 1, 1], [], []>} : vector<16x48xbf16>, vector<48x32xbf16>, vector<16x32xf32> -> vector<16x32xf32>
    %c0_4 = arith.constant 0 : index
    %c0_5 = arith.constant 0 : index
    %4 = vector.load %arg5[%c0_4, %c0_5] : memref<1x32xf32, #tpu.memory_space<vmem>>, vector<1x32xf32>
    %5 = vector.broadcast %4 : vector<1x32xf32> to vector<16x32xf32>
    %6 = arith.addf %3, %5 : vector<16x32xf32>
    %c0_6 = arith.constant 0 : index
    %c0_7 = arith.constant 0 : index
    %7 = vector.load %arg6[%c0_6, %c0_7] : memref<16x32xbf16, #tpu.memory_space<vmem>>, vector<16x32xbf16>
    %8 = arith.extf %7 : vector<16x32xbf16> to vector<16x32xf32>
    %9 = arith.addf %6, %8 : vector<16x32xf32>
    %10 = arith.truncf %9 : vector<16x32xf32> to vector<16x32xbf16>
    %c0_8 = arith.constant 0 : index
    %c0_9 = arith.constant 0 : index
    %c0_10 = arith.constant 0 : index
    %11 = vector.load %arg7[%c0_8, %c0_9, %c0_10] : memref<1x16x32xbf16, #tpu.memory_space<vmem>>, vector<1x16x32xbf16>
    %12 = vector.shape_cast %11 : vector<1x16x32xbf16> to vector<16x32xbf16>
    %13 = vector.shape_cast %10 : vector<16x32xbf16> to vector<1x16x32xbf16>
    tpu.vector_store %arg7[%c0_8, %c0_9, %c0_10], %13 {strides = array<i32>} : memref<1x16x32xbf16, #tpu.memory_space<vmem>>, vector<1x16x32xbf16>,
    return
  }
  func.func @transform_0(%arg0: i32, %arg1: i32, %arg2: i32) -> (i32, i32, i32) {
    %c0_i32 = arith.constant 0 : i32
    %c0_i32_0 = arith.constant 0 : i32
    return %arg0, %arg1, %c0_i32 : i32, i32, i32
  }
  func.func @transform_1(%arg0: i32, %arg1: i32, %arg2: i32) -> (i32, i32) {
    %c0_i32 = arith.constant 0 : i32
    %c0_i32_0 = arith.constant 0 : i32
    return %c0_i32, %arg2 : i32, i32
  }
  func.func @transform_2(%arg0: i32, %arg1: i32, %arg2: i32) -> (i32, i32) {
    %c0_i32 = arith.constant 0 : i32
    %c0_i32_0 = arith.constant 0 : i32
    return %c0_i32, %arg2 : i32, i32
  }
  func.func @transform_3(%arg0: i32, %arg1: i32, %arg2: i32) -> (i32, i32) {
    %c0_i32 = arith.constant 0 : i32
    return %arg1, %arg2 : i32, i32
  }
  func.func @transform_4(%arg0: i32, %arg1: i32, %arg2: i32) -> (i32, i32, i32) {
    %c0_i32 = arith.constant 0 : i32
    return %arg0, %arg1, %arg2 : i32, i32, i32
  }
}

module attributes {stable_mosaic.version = 11 : i64} {
  func.func @_norm_matmul_kernel(%arg0: i32, %arg1: i32, %arg2: i32, %arg3: memref<1x16x32xbf16, #tpu.memory_space<vmem>>, %arg4: memref<1x1x32xf32, #tpu.memory_space<vmem>>, %arg5: memref<1x1x32xf32, #tpu.memory_space<vmem>>, %arg6: memref<32x96xbf16, #tpu.memory_space<vmem>>, %arg7: memref<1x96xf32, #tpu.memory_space<vmem>>, %arg8: memref<1x16x96xbf16, #tpu.memory_space<vmem>>, %arg9: memref<16x32xbf16, #tpu.memory_space<vmem>>) attributes {dimension_semantics = [#tpu.dimension_semantics<parallel>, #tpu.dimension_semantics<parallel>, #tpu.dimension_semantics<arbitrary>], iteration_bounds = array<i64: 2, 1, 1>, scalar_prefetch = 0 : i64, scratch_operands = 1 : i64, tpu.core_type = #tpu.core_type<tc>, window_params = [{transform_indices = @transform_0, window_bounds = array<i64: 1, 16, 32>}, {transform_indices = @transform_1, window_bounds = array<i64: 1, 1, 32>}, {transform_indices = @transform_2, window_bounds = array<i64: 1, 1, 32>}, {transform_indices = @transform_3, window_bounds = array<i64: 32, 96>}, {transform_indices = @transform_4, window_bounds = array<i64: 1, 96>}, {transform_indices = @transform_5, window_bounds = array<i64: 1, 16, 96>}]} {
    %c0_i32 = arith.constant 0 : i32
    %0 = arith.cmpi eq, %arg2, %c0_i32 : i32
    %1 = arith.extui %0 : i1 to i32
    %c0_i32_0 = arith.constant 0 : i32
    %2 = arith.cmpi ne, %1, %c0_i32_0 : i32
    scf.if %2 {
      %c0_9 = arith.constant 0 : index
      %c0_10 = arith.constant 0 : index
      %c0_11 = arith.constant 0 : index
      %13 = vector.load %arg3[%c0_9, %c0_10, %c0_11] : memref<1x16x32xbf16, #tpu.memory_space<vmem>>, vector<1x16x32xbf16>
      %14 = vector.shape_cast %13 : vector<1x16x32xbf16> to vector<16x32xbf16>
      %15 = arith.extf %14 : vector<16x32xbf16> to vector<16x32xf32>
      %cst_12 = arith.constant dense<0.000000e+00> : vector<16xf32>
      %16 = vector.multi_reduction <add>, %15, %cst_12 [1] : vector<16x32xf32> to vector<16xf32>
      %17 = vector.shape_cast %16 : vector<16xf32> to vector<16x1xf32>
      %cst_13 = arith.constant 3.200000e+01 : f32
      %18 = vector.broadcast %cst_13 : f32 to vector<16x1xf32>
      %19 = arith.divf %17, %18 : vector<16x1xf32>
      %20 = vector.broadcast %19 : vector<16x1xf32> to vector<16x32xf32>
      %21 = arith.subf %15, %20 : vector<16x32xf32>
      %22 = arith.mulf %21, %21 : vector<16x32xf32>
      %cst_14 = arith.constant dense<0.000000e+00> : vector<16xf32>
      %23 = vector.multi_reduction <add>, %22, %cst_14 [1] : vector<16x32xf32> to vector<16xf32>
      %24 = vector.shape_cast %23 : vector<16xf32> to vector<16x1xf32>
      %cst_15 = arith.constant 3.200000e+01 : f32
      %25 = vector.broadcast %cst_15 : f32 to vector<16x1xf32>
      %26 = arith.divf %24, %25 : vector<16x1xf32>
      %27 = vector.broadcast %19 : vector<16x1xf32> to vector<16x32xf32>
      %28 = arith.subf %15, %27 : vector<16x32xf32>
      %cst_16 = arith.constant 9.99999997E-7 : f32
      %29 = vector.broadcast %cst_16 : f32 to vector<16x1xf32>
      %30 = arith.addf %26, %29 : vector<16x1xf32>
      %31 = math.rsqrt %30 : vector<16x1xf32>
      %32 = vector.broadcast %31 : vector<16x1xf32> to vector<16x32xf32>
      %33 = arith.mulf %28, %32 : vector<16x32xf32>
      %c0_17 = arith.constant 0 : index
      %c0_18 = arith.constant 0 : index
      %c0_19 = arith.constant 0 : index
      %34 = vector.load %arg4[%c0_17, %c0_18, %c0_19] : memref<1x1x32xf32, #tpu.memory_space<vmem>>, vector<1x1x32xf32>
      %35 = vector.shape_cast %34 : vector<1x1x32xf32> to vector<1x32xf32>
      %c0_20 = arith.constant 0 : index
      %c0_21 = arith.constant 0 : index
      %c0_22 = arith.constant 0 : index
      %36 = vector.load %arg5[%c0_20, %c0_21, %c0_22] : memref<1x1x32xf32, #tpu.memory_space<vmem>>, vector<1x1x32xf32>
      %37 = vector.shape_cast %36 : vector<1x1x32xf32> to vector<1x32xf32>
      %38 = vector.broadcast %35 : vector<1x32xf32> to vector<16x32xf32>
      %39 = arith.mulf %38, %33 : vector<16x32xf32>
      %40 = vector.broadcast %37 : vector<1x32xf32> to vector<16x32xf32>
      %41 = arith.addf %39, %40 : vector<16x32xf32>
      %42 = arith.truncf %41 : vector<16x32xf32> to vector<16x32xbf16>
      %c0_23 = arith.constant 0 : index
      %c0_24 = arith.constant 0 : index
      %43 = vector.load %arg9[%c0_23, %c0_24] : memref<16x32xbf16, #tpu.memory_space<vmem>>, vector<16x32xbf16>
      tpu.vector_store %arg9[%c0_23, %c0_24], %42 {strides = array<i32>} : memref<16x32xbf16, #tpu.memory_space<vmem>>, vector<16x32xbf16>,
    } else {
    }
    %c0 = arith.constant 0 : index
    %c0_1 = arith.constant 0 : index
    %3 = vector.load %arg9[%c0, %c0_1] : memref<16x32xbf16, #tpu.memory_space<vmem>>, vector<16x32xbf16>
    %c0_2 = arith.constant 0 : index
    %c0_3 = arith.constant 0 : index
    %4 = vector.load %arg6[%c0_2, %c0_3] : memref<32x96xbf16, #tpu.memory_space<vmem>>, vector<32x96xbf16>
    %cst = arith.constant dense<0.000000e+00> : vector<16x96xf32>
    %5 = tpu.matmul %3, %4, %cst {dimension_numbers = #tpu.dot_dimension_numbers<[1], [0], [0], [1], [0, 0, 1, 1], [], []>} : vector<16x32xbf16>, vector<32x96xbf16>, vector<16x96xf32> -> vector<16x96xf32>
    %c0_4 = arith.constant 0 : index
    %c0_5 = arith.constant 0 : index
    %6 = vector.load %arg7[%c0_4, %c0_5] : memref<1x96xf32, #tpu.memory_space<vmem>>, vector<1x96xf32>
    %7 = vector.broadcast %6 : vector<1x96xf32> to vector<16x96xf32>
    %8 = arith.addf %5, %7 : vector<16x96xf32>
    %9 = arith.truncf %8 : vector<16x96xf32> to vector<16x96xbf16>
    %c0_6 = arith.constant 0 : index
    %c0_7 = arith.constant 0 : index
    %c0_8 = arith.constant 0 : index
    %10 = vector.load %arg8[%c0_6, %c0_7, %c0_8] : memref<1x16x96xbf16, #tpu.memory_space<vmem>>, vector<1x16x96xbf16>
    %11 = vector.shape_cast %10 : vector<1x16x96xbf16> to vector<16x96xbf16>
    %12 = vector.shape_cast %9 : vector<16x96xbf16> to vector<1x16x96xbf16>
    tpu.vector_store %arg8[%c0_6, %c0_7, %c0_8], %12 {strides = array<i32>} : memref<1x16x96xbf16, #tpu.memory_space<vmem>>, vector<1x16x96xbf16>,
    return
  }
  func.func @transform_0(%arg0: i32, %arg1: i32, %arg2: i32) -> (i32, i32, i32) {
    %c0_i32 = arith.constant 0 : i32
    %c0_i32_0 = arith.constant 0 : i32
    return %arg0, %arg1, %c0_i32 : i32, i32, i32
  }
  func.func @transform_1(%arg0: i32, %arg1: i32, %arg2: i32) -> (i32, i32, i32) {
    %c0_i32 = arith.constant 0 : i32
    %c0_i32_0 = arith.constant 0 : i32
    %c0_i32_1 = arith.constant 0 : i32
    return %arg0, %c0_i32, %c0_i32_0 : i32, i32, i32
  }
  func.func @transform_2(%arg0: i32, %arg1: i32, %arg2: i32) -> (i32, i32, i32) {
    %c0_i32 = arith.constant 0 : i32
    %c0_i32_0 = arith.constant 0 : i32
    %c0_i32_1 = arith.constant 0 : i32
    return %arg0, %c0_i32, %c0_i32_0 : i32, i32, i32
  }
  func.func @transform_3(%arg0: i32, %arg1: i32, %arg2: i32) -> (i32, i32) {
    %c0_i32 = arith.constant 0 : i32
    %c0_i32_0 = arith.constant 0 : i32
    return %c0_i32, %arg2 : i32, i32
  }
  func.func @transform_4(%arg0: i32, %arg1: i32, %arg2: i32) -> (i32, i32) {
    %c0_i32 = arith.constant 0 : i32
    %c0_i32_0 = arith.constant 0 : i32
    return %c0_i32, %arg2 : i32, i32
  }
  func.func @transform_5(%arg0: i32, %arg1: i32, %arg2: i32) -> (i32, i32, i32) {
    %c0_i32 = arith.constant 0 : i32
    return %arg0, %arg1, %arg2 : i32, i32, i32
  }
}

module attributes {stable_mosaic.version = 11 : i64} {
  func.func @_attn_kernel(%arg0: i32, %arg1: i32, %arg2: i32, %arg3: memref<1x16x8xbf16, #tpu.memory_space<vmem>>, %arg4: memref<1x16x8xbf16, #tpu.memory_space<vmem>>, %arg5: memref<1x16x8xbf16, #tpu.memory_space<vmem>>, %arg6: memref<1x16x8xbf16, #tpu.memory_space<vmem>>) attributes {dimension_semantics = [#tpu.dimension_semantics<parallel>, #tpu.dimension_semantics<parallel>, #tpu.dimension_semantics<parallel>], iteration_bounds = array<i64: 2, 4, 1>, scalar_prefetch = 0 : i64, scratch_operands = 0 : i64, tpu.core_type = #tpu.core_type<tc>, window_params = [{transform_indices = @transform_0, window_bounds = array<i64: 1, 16, 8>}, {transform_indices = @transform_1, window_bounds = array<i64: 1, 16, 8>}, {transform_indices = @transform_2, window_bounds = array<i64: 1, 16, 8>}, {transform_indices = @transform_3, window_bounds = array<i64: 1, 16, 8>}]} {
    %c0 = arith.constant 0 : index
    %c0_0 = arith.constant 0 : index
    %c0_1 = arith.constant 0 : index
    %0 = vector.load %arg3[%c0, %c0_0, %c0_1] : memref<1x16x8xbf16, #tpu.memory_space<vmem>>, vector<1x16x8xbf16>
    %1 = vector.shape_cast %0 : vector<1x16x8xbf16> to vector<16x8xbf16>
    %cst = arith.constant 3.535160e-01 : bf16
    %2 = vector.broadcast %cst : bf16 to vector<16x8xbf16>
    %3 = arith.mulf %1, %2 : vector<16x8xbf16>
    %c0_2 = arith.constant 0 : index
    %c0_3 = arith.constant 0 : index
    %c0_4 = arith.constant 0 : index
    %4 = vector.load %arg4[%c0_2, %c0_3, %c0_4] : memref<1x16x8xbf16, #tpu.memory_space<vmem>>, vector<1x16x8xbf16>
    %5 = vector.shape_cast %4 : vector<1x16x8xbf16> to vector<16x8xbf16>
    %c0_5 = arith.constant 0 : index
    %c0_6 = arith.constant 0 : index
    %c0_7 = arith.constant 0 : index
    %6 = vector.load %arg5[%c0_5, %c0_6, %c0_7] : memref<1x16x8xbf16, #tpu.memory_space<vmem>>, vector<1x16x8xbf16>
    %7 = vector.shape_cast %6 : vector<1x16x8xbf16> to vector<16x8xbf16>
    %cst_8 = arith.constant dense<0.000000e+00> : vector<16x16xf32>
    %8 = tpu.matmul %3, %5, %cst_8 {dimension_numbers = #tpu.dot_dimension_numbers<[1], [1], [0], [0], [0, 0, 1, 0], [], []>} : vector<16x8xbf16>, vector<16x8xbf16>, vector<16x16xf32> -> vector<16x16xf32>
    %cst_9 = arith.constant dense<0xFF800000> : vector<16xf32>
    %9 = vector.multi_reduction <maximumf>, %8, %cst_9 [1] : vector<16x16xf32> to vector<16xf32>
    %10 = vector.shape_cast %9 : vector<16xf32> to vector<16x1xf32>
    %11 = vector.broadcast %10 : vector<16x1xf32> to vector<16x16xf32>
    %12 = arith.subf %8, %11 : vector<16x16xf32>
    %13 = math.exp %12 : vector<16x16xf32>
    %cst_10 = arith.constant dense<0.000000e+00> : vector<16xf32>
    %14 = vector.multi_reduction <add>, %13, %cst_10 [1] : vector<16x16xf32> to vector<16xf32>
    %15 = vector.shape_cast %14 : vector<16xf32> to vector<16x1xf32>
    %16 = tpu.reciprocal %15 {approx = true} : vector<16x1xf32> -> vector<16x1xf32>
    %17 = vector.broadcast %16 : vector<16x1xf32> to vector<16x16xf32>
    %18 = arith.mulf %13, %17 : vector<16x16xf32>
    %19 = arith.truncf %18 : vector<16x16xf32> to vector<16x16xbf16>
    %cst_11 = arith.constant dense<0.000000e+00> : vector<16x8xf32>
    %20 = tpu.matmul %19, %7, %cst_11 {dimension_numbers = #tpu.dot_dimension_numbers<[1], [0], [0], [1], [0, 0, 1, 1], [], []>} : vector<16x16xbf16>, vector<16x8xbf16>, vector<16x8xf32> -> vector<16x8xf32>
    %21 = arith.truncf %20 : vector<16x8xf32> to vector<16x8xbf16>
    %c0_12 = arith.constant 0 : index
    %c0_13 = arith.constant 0 : index
    %c0_14 = arith.constant 0 : index
    %22 = vector.load %arg6[%c0_12, %c0_13, %c0_14] : memref<1x16x8xbf16, #tpu.memory_space<vmem>>, vector<1x16x8xbf16>
    %23 = vector.shape_cast %22 : vector<1x16x8xbf16> to vector<16x8xbf16>
    %24 = vector.shape_cast %21 : vector<16x8xbf16> to vector<1x16x8xbf16>
    tpu.vector_store %arg6[%c0_12, %c0_13, %c0_14], %24 {strides = array<i32>} : memref<1x16x8xbf16, #tpu.memory_space<vmem>>, vector<1x16x8xbf16>,
    return
  }
  func.func @transform_0(%arg0: i32, %arg1: i32, %arg2: i32) -> (i32, i32, i32) {
    %c4_i32 = arith.constant 4 : i32
    %0 = arith.muli %arg0, %c4_i32 : i32
    %1 = arith.addi %0, %arg1 : i32
    %c0_i32 = arith.constant 0 : i32
    %c0_i32_0 = arith.constant 0 : i32
    return %1, %arg2, %c0_i32 : i32, i32, i32
  }
  func.func @transform_1(%arg0: i32, %arg1: i32, %arg2: i32) -> (i32, i32, i32) {
    %c4_i32 = arith.constant 4 : i32
    %0 = arith.muli %arg0, %c4_i32 : i32
    %c8_i32 = arith.constant 8 : i32
    %1 = arith.addi %c8_i32, %0 : i32
    %2 = arith.addi %1, %arg1 : i32
    %c0_i32 = arith.constant 0 : i32
    %c0_i32_0 = arith.constant 0 : i32
    %c0_i32_1 = arith.constant 0 : i32
    return %2, %c0_i32, %c0_i32_0 : i32, i32, i32
  }
  func.func @transform_2(%arg0: i32, %arg1: i32, %arg2: i32) -> (i32, i32, i32) {
    %c4_i32 = arith.constant 4 : i32
    %0 = arith.muli %arg0, %c4_i32 : i32
    %c16_i32 = arith.constant 16 : i32
    %1 = arith.addi %c16_i32, %0 : i32
    %2 = arith.addi %1, %arg1 : i32
    %c0_i32 = arith.constant 0 : i32
    %c0_i32_0 = arith.constant 0 : i32
    %c0_i32_1 = arith.constant 0 : i32
    return %2, %c0_i32, %c0_i32_0 : i32, i32, i32
  }
  func.func @transform_3(%arg0: i32, %arg1: i32, %arg2: i32) -> (i32, i32, i32) {
    %c4_i32 = arith.constant 4 : i32
    %0 = arith.muli %arg0, %c4_i32 : i32
    %1 = arith.addi %0, %arg1 : i32
    %c0_i32 = arith.constant 0 : i32
    %c0_i32_0 = arith.constant 0 : i32
    return %1, %arg2, %c0_i32 : i32, i32, i32
  }
}

module attributes {stable_mosaic.version = 11 : i64} {
  func.func @_norm_matmul_kernel(%arg0: i32, %arg1: i32, %arg2: i32, %arg3: memref<1x16x32xbf16, #tpu.memory_space<vmem>>, %arg4: memref<1x1x32xf32, #tpu.memory_space<vmem>>, %arg5: memref<1x1x32xf32, #tpu.memory_space<vmem>>, %arg6: memref<32x128xbf16, #tpu.memory_space<vmem>>, %arg7: memref<1x128xf32, #tpu.memory_space<vmem>>, %arg8: memref<1x16x128xbf16, #tpu.memory_space<vmem>>, %arg9: memref<16x32xbf16, #tpu.memory_space<vmem>>) attributes {dimension_semantics = [#tpu.dimension_semantics<parallel>, #tpu.dimension_semantics<parallel>, #tpu.dimension_semantics<arbitrary>], iteration_bounds = array<i64: 2, 1, 1>, scalar_prefetch = 0 : i64, scratch_operands = 1 : i64, tpu.core_type = #tpu.core_type<tc>, window_params = [{transform_indices = @transform_0, window_bounds = array<i64: 1, 16, 32>}, {transform_indices = @transform_1, window_bounds = array<i64: 1, 1, 32>}, {transform_indices = @transform_2, window_bounds = array<i64: 1, 1, 32>}, {transform_indices = @transform_3, window_bounds = array<i64: 32, 128>}, {transform_indices = @transform_4, window_bounds = array<i64: 1, 128>}, {transform_indices = @transform_5, window_bounds = array<i64: 1, 16, 128>}]} {
    %c0_i32 = arith.constant 0 : i32
    %0 = arith.cmpi eq, %arg2, %c0_i32 : i32
    %1 = arith.extui %0 : i1 to i32
    %c0_i32_0 = arith.constant 0 : i32
    %2 = arith.cmpi ne, %1, %c0_i32_0 : i32
    scf.if %2 {
      %c0_12 = arith.constant 0 : index
      %c0_13 = arith.constant 0 : index
      %c0_14 = arith.constant 0 : index
      %21 = vector.load %arg3[%c0_12, %c0_13, %c0_14] : memref<1x16x32xbf16, #tpu.memory_space<vmem>>, vector<1x16x32xbf16>
      %22 = vector.shape_cast %21 : vector<1x16x32xbf16> to vector<16x32xbf16>
      %23 = arith.extf %22 : vector<16x32xbf16> to vector<16x32xf32>
      %cst_15 = arith.constant dense<0.000000e+00> : vector<16xf32>
      %24 = vector.multi_reduction <add>, %23, %cst_15 [1] : vector<16x32xf32> to vector<16xf32>
      %25 = vector.shape_cast %24 : vector<16xf32> to vector<16x1xf32>
      %cst_16 = arith.constant 3.200000e+01 : f32
      %26 = vector.broadcast %cst_16 : f32 to vector<16x1xf32>
      %27 = arith.divf %25, %26 : vector<16x1xf32>
      %28 = vector.broadcast %27 : vector<16x1xf32> to vector<16x32xf32>
      %29 = arith.subf %23, %28 : vector<16x32xf32>
      %30 = arith.mulf %29, %29 : vector<16x32xf32>
      %cst_17 = arith.constant dense<0.000000e+00> : vector<16xf32>
      %31 = vector.multi_reduction <add>, %30, %cst_17 [1] : vector<16x32xf32> to vector<16xf32>
      %32 = vector.shape_cast %31 : vector<16xf32> to vector<16x1xf32>
      %cst_18 = arith.constant 3.200000e+01 : f32
      %33 = vector.broadcast %cst_18 : f32 to vector<16x1xf32>
      %34 = arith.divf %32, %33 : vector<16x1xf32>
      %35 = vector.broadcast %27 : vector<16x1xf32> to vector<16x32xf32>
      %36 = arith.subf %23, %35 : vector<16x32xf32>
      %cst_19 = arith.constant 9.99999997E-7 : f32
      %37 = vector.broadcast %cst_19 : f32 to vector<16x1xf32>
      %38 = arith.addf %34, %37 : vector<16x1xf32>
      %39 = math.rsqrt %38 : vector<16x1xf32>
      %40 = vector.broadcast %39 : vector<16x1xf32> to vector<16x32xf32>
      %41 = arith.mulf %36, %40 : vector<16x32xf32>
      %c0_20 = arith.constant 0 : index
      %c0_21 = arith.constant 0 : index
      %c0_22 = arith.constant 0 : index
      %42 = vector.load %arg4[%c0_20, %c0_21, %c0_22] : memref<1x1x32xf32, #tpu.memory_space<vmem>>, vector<1x1x32xf32>
      %43 = vector.shape_cast %42 : vector<1x1x32xf32> to vector<1x32xf32>
      %c0_23 = arith.constant 0 : index
      %c0_24 = arith.constant 0 : index
      %c0_25 = arith.constant 0 : index
      %44 = vector.load %arg5[%c0_23, %c0_24, %c0_25] : memref<1x1x32xf32, #tpu.memory_space<vmem>>, vector<1x1x32xf32>
      %45 = vector.shape_cast %44 : vector<1x1x32xf32> to vector<1x32xf32>
      %46 = vector.broadcast %43 : vector<1x32xf32> to vector<16x32xf32>
      %47 = arith.mulf %46, %41 : vector<16x32xf32>
      %48 = vector.broadcast %45 : vector<1x32xf32> to vector<16x32xf32>
      %49 = arith.addf %47, %48 : vector<16x32xf32>
      %50 = arith.truncf %49 : vector<16x32xf32> to vector<16x32xbf16>
      %c0_26 = arith.constant 0 : index
      %c0_27 = arith.constant 0 : index
      %51 = vector.load %arg9[%c0_26, %c0_27] : memref<16x32xbf16, #tpu.memory_space<vmem>>, vector<16x32xbf16>
      tpu.vector_store %arg9[%c0_26, %c0_27], %50 {strides = array<i32>} : memref<16x32xbf16, #tpu.memory_space<vmem>>, vector<16x32xbf16>,
    } else {
    }
    %c0 = arith.constant 0 : index
    %c0_1 = arith.constant 0 : index
    %3 = vector.load %arg9[%c0, %c0_1] : memref<16x32xbf16, #tpu.memory_space<vmem>>, vector<16x32xbf16>
    %c0_2 = arith.constant 0 : index
    %c0_3 = arith.constant 0 : index
    %4 = vector.load %arg6[%c0_2, %c0_3] : memref<32x128xbf16, #tpu.memory_space<vmem>>, vector<32x128xbf16>
    %cst = arith.constant dense<0.000000e+00> : vector<16x128xf32>
    %5 = tpu.matmul %3, %4, %cst {dimension_numbers = #tpu.dot_dimension_numbers<[1], [0], [0], [1], [0, 0, 1, 1], [], []>} : vector<16x32xbf16>, vector<32x128xbf16>, vector<16x128xf32> -> vector<16x128xf32>
    %c0_4 = arith.constant 0 : index
    %c0_5 = arith.constant 0 : index
    %6 = vector.load %arg7[%c0_4, %c0_5] : memref<1x128xf32, #tpu.memory_space<vmem>>, vector<1x128xf32>
    %7 = vector.broadcast %6 : vector<1x128xf32> to vector<16x128xf32>
    %8 = arith.addf %5, %7 : vector<16x128xf32>
    %cst_6 = arith.constant 5.000000e-01 : f32
    %9 = vector.broadcast %cst_6 : f32 to vector<16x128xf32>
    %10 = arith.mulf %9, %8 : vector<16x128xf32>
    %cst_7 = arith.constant 0.707106769 : f32
    %11 = vector.broadcast %cst_7 : f32 to vector<16x128xf32>
    %12 = arith.mulf %8, %11 : vector<16x128xf32>
    %13 = math.erf %12 : vector<16x128xf32>
    %cst_8 = arith.constant 1.000000e+00 : f32
    %14 = vector.broadcast %cst_8 : f32 to vector<16x128xf32>
    %15 = arith.addf %14, %13 : vector<16x128xf32>
    %16 = arith.mulf %10, %15 : vector<16x128xf32>
    %17 = arith.truncf %16 : vector<16x128xf32> to vector<16x128xbf16>
    %c0_9 = arith.constant 0 : index
    %c0_10 = arith.constant 0 : index
    %c0_11 = arith.constant 0 : index
    %18 = vector.load %arg8[%c0_9, %c0_10, %c0_11] : memref<1x16x128xbf16, #tpu.memory_space<vmem>>, vector<1x16x128xbf16>
    %19 = vector.shape_cast %18 : vector<1x16x128xbf16> to vector<16x128xbf16>
    %20 = vector.shape_cast %17 : vector<16x128xbf16> to vector<1x16x128xbf16>
    tpu.vector_store %arg8[%c0_9, %c0_10, %c0_11], %20 {strides = array<i32>} : memref<1x16x128xbf16, #tpu.memory_space<vmem>>, vector<1x16x128xbf16>,
    return
  }
  func.func @transform_0(%arg0: i32, %arg1: i32, %arg2: i32) -> (i32, i32, i32) {
    %c0_i32 = arith.constant 0 : i32
    %c0_i32_0 = arith.constant 0 : i32
    return %arg0, %arg1, %c0_i32 : i32, i32, i32
  }
  func.func @transform_1(%arg0: i32, %arg1: i32, %arg2: i32) -> (i32, i32, i32) {
    %c0_i32 = arith.constant 0 : i32
    %c0_i32_0 = arith.constant 0 : i32
    %c0_i32_1 = arith.constant 0 : i32
    return %arg0, %c0_i32, %c0_i32_0 : i32, i32, i32
  }
  func.func @transform_2(%arg0: i32, %arg1: i32, %arg2: i32) -> (i32, i32, i32) {
    %c0_i32 = arith.constant 0 : i32
    %c0_i32_0 = arith.constant 0 : i32
    %c0_i32_1 = arith.constant 0 : i32
    return %arg0, %c0_i32, %c0_i32_0 : i32, i32, i32
  }
  func.func @transform_3(%arg0: i32, %arg1: i32, %arg2: i32) -> (i32, i32) {
    %c0_i32 = arith.constant 0 : i32
    %c0_i32_0 = arith.constant 0 : i32
    return %c0_i32, %arg2 : i32, i32
  }
  func.func @transform_4(%arg0: i32, %arg1: i32, %arg2: i32) -> (i32, i32) {
    %c0_i32 = arith.constant 0 : i32
    %c0_i32_0 = arith.constant 0 : i32
    return %c0_i32, %arg2 : i32, i32
  }
  func.func @transform_5(%arg0: i32, %arg1: i32, %arg2: i32) -> (i32, i32, i32) {
    %c0_i32 = arith.constant 0 : i32
    return %arg0, %arg1, %arg2 : i32, i32, i32
  }
}

module attributes {stable_mosaic.version = 11 : i64} {
  func.func @_headsum_matmul_kernel(%arg0: i32, %arg1: i32, %arg2: i32, %arg3: i32, %arg4: memref<1x16x8xbf16, #tpu.memory_space<vmem>>, %arg5: memref<8x32xbf16, #tpu.memory_space<vmem>>, %arg6: memref<1x32xf32, #tpu.memory_space<vmem>>, %arg7: memref<1x16x32xbf16, #tpu.memory_space<vmem>>, %arg8: memref<1x16x32xbf16, #tpu.memory_space<vmem>>, %arg9: memref<16x32xf32, #tpu.memory_space<vmem>>) attributes {dimension_semantics = [#tpu.dimension_semantics<parallel>, #tpu.dimension_semantics<parallel>, #tpu.dimension_semantics<parallel>, #tpu.dimension_semantics<arbitrary>], iteration_bounds = array<i64: 2, 1, 1, 4>, scalar_prefetch = 0 : i64, scratch_operands = 1 : i64, tpu.core_type = #tpu.core_type<tc>, window_params = [{transform_indices = @transform_0, window_bounds = array<i64: 1, 16, 8>}, {transform_indices = @transform_1, window_bounds = array<i64: 8, 32>}, {transform_indices = @transform_2, window_bounds = array<i64: 1, 32>}, {transform_indices = @transform_3, window_bounds = array<i64: 1, 16, 32>}, {transform_indices = @transform_4, window_bounds = array<i64: 1, 16, 32>}]} {
    %c0_i32 = arith.constant 0 : i32
    %0 = arith.cmpi eq, %arg3, %c0_i32 : i32
    %1 = arith.extui %0 : i1 to i32
    %c0_i32_0 = arith.constant 0 : i32
    %2 = arith.cmpi ne, %1, %c0_i32_0 : i32
    scf.if %2 {
      %cst_10 = arith.constant 0.000000e+00 : f32
      %13 = vector.broadcast %cst_10 : f32 to vector<16x32xf32>
      %c0_11 = arith.constant 0 : index
      %c0_12 = arith.constant 0 : index
      %14 = vector.load %arg9[%c0_11, %c0_12] : memref<16x32xf32, #tpu.memory_space<vmem>>, vector<16x32xf32>
      tpu.vector_store %arg9[%c0_11, %c0_12], %13 {strides = array<i32>} : memref<16x32xf32, #tpu.memory_space<vmem>>, vector<16x32xf32>,
    } else {
    }
    %c0 = arith.constant 0 : index
    %c0_1 = arith.constant 0 : index
    %3 = vector.load %arg9[%c0, %c0_1] : memref<16x32xf32, #tpu.memory_space<vmem>>, vector<16x32xf32>
    %c0_2 = arith.constant 0 : index
    %c0_3 = arith.constant 0 : index
    %c0_4 = arith.constant 0 : index
    %4 = vector.load %arg4[%c0_2, %c0_3, %c0_4] : memref<1x16x8xbf16, #tpu.memory_space<vmem>>, vector<1x16x8xbf16>
    %5 = vector.shape_cast %4 : vector<1x16x8xbf16> to vector<16x8xbf16>
    %c0_5 = arith.constant 0 : index
    %c0_6 = arith.constant 0 : index
    %6 = vector.load %arg5[%c0_5, %c0_6] : memref<8x32xbf16, #tpu.memory_space<vmem>>, vector<8x32xbf16>
    %cst = arith.constant dense<0.000000e+00> : vector<16x32xf32>
    %7 = tpu.matmul %5, %6, %cst {dimension_numbers = #tpu.dot_dimension_numbers<[1], [0], [0], [1], [0, 0, 1, 1], [], []>} : vector<16x8xbf16>, vector<8x32xbf16>, vector<16x32xf32> -> vector<16x32xf32>
    %8 = arith.addf %3, %7 : vector<16x32xf32>
    %c0_7 = arith.constant 0 : index
    %c0_8 = arith.constant 0 : index
    %9 = vector.load %arg9[%c0_7, %c0_8] : memref<16x32xf32, #tpu.memory_space<vmem>>, vector<16x32xf32>
    tpu.vector_store %arg9[%c0_7, %c0_8], %8 {strides = array<i32>} : memref<16x32xf32, #tpu.memory_space<vmem>>, vector<16x32xf32>,
    %c3_i32 = arith.constant 3 : i32
    %10 = arith.cmpi eq, %arg3, %c3_i32 : i32
    %11 = arith.extui %10 : i1 to i32
    %c0_i32_9 = arith.constant 0 : i32
    %12 = arith.cmpi ne, %11, %c0_i32_9 : i32
    scf.if %12 {
      %c0_10 = arith.constant 0 : index
      %c0_11 = arith.constant 0 : index
      %13 = vector.load %arg9[%c0_10, %c0_11] : memref<16x32xf32, #tpu.memory_space<vmem>>, vector<16x32xf32>
      %c0_12 = arith.constant 0 : index
      %c0_13 = arith.constant 0 : index
      %14 = vector.load %arg6[%c0_12, %c0_13] : memref<1x32xf32, #tpu.memory_space<vmem>>, vector<1x32xf32>
      %15 = vector.broadcast %14 : vector<1x32xf32> to vector<16x32xf32>
      %16 = arith.addf %13, %15 : vector<16x32xf32>
      %c0_14 = arith.constant 0 : index
      %c0_15 = arith.constant 0 : index
      %c0_16 = arith.constant 0 : index
      %17 = vector.load %arg7[%c0_14, %c0_15, %c0_16] : memref<1x16x32xbf16, #tpu.memory_space<vmem>>, vector<1x16x32xbf16>
      %18 = vector.shape_cast %17 : vector<1x16x32xbf16> to vector<16x32xbf16>
      %19 = arith.extf %18 : vector<16x32xbf16> to vector<16x32xf32>
      %20 = arith.addf %16, %19 : vector<16x32xf32>
      %21 = arith.truncf %20 : vector<16x32xf32> to vector<16x32xbf16>
      %c0_17 = arith.constant 0 : index
      %c0_18 = arith.constant 0 : index
      %c0_19 = arith.constant 0 : index
      %22 = vector.load %arg8[%c0_17, %c0_18, %c0_19] : memref<1x16x32xbf16, #tpu.memory_space<vmem>>, vector<1x16x32xbf16>
      %23 = vector.shape_cast %22 : vector<1x16x32xbf16> to vector<16x32xbf16>
      %24 = vector.shape_cast %21 : vector<16x32xbf16> to vector<1x16x32xbf16>
      tpu.vector_store %arg8[%c0_17, %c0_18, %c0_19], %24 {strides = array<i32>} : memref<1x16x32xbf16, #tpu.memory_space<vmem>>, vector<1x16x32xbf16>,
    } else {
    }
    return
  }
  func.func @transform_0(%arg0: i32, %arg1: i32, %arg2: i32, %arg3: i32) -> (i32, i32, i32) {
    %c4_i32 = arith.constant 4 : i32
    %0 = arith.muli %arg0, %c4_i32 : i32
    %1 = arith.addi %0, %arg3 : i32
    %c0_i32 = arith.constant 0 : i32
    %c0_i32_0 = arith.constant 0 : i32
    return %1, %arg1, %c0_i32 : i32, i32, i32
  }
  func.func @transform_1(%arg0: i32, %arg1: i32, %arg2: i32, %arg3: i32) -> (i32, i32) {
    %c0_i32 = arith.constant 0 : i32
    return %arg3, %arg2 : i32, i32
  }
  func.func @transform_2(%arg0: i32, %arg1: i32, %arg2: i32, %arg3: i32) -> (i32, i32) {
    %c0_i32 = arith.constant 0 : i32
    %c0_i32_0 = arith.constant 0 : i32
    return %c0_i32, %arg2 : i32, i32
  }
  func.func @transform_3(%arg0: i32, %arg1: i32, %arg2: i32, %arg3: i32) -> (i32, i32, i32) {
    %c0_i32 = arith.constant 0 : i32
    return %arg0, %arg1, %arg2 : i32, i32, i32
  }
  func.func @transform_4(%arg0: i32, %arg1: i32, %arg2: i32, %arg3: i32) -> (i32, i32, i32) {
    %c0_i32 = arith.constant 0 : i32
    return %arg0, %arg1, %arg2 : i32, i32, i32
  }
}

module attributes {stable_mosaic.version = 11 : i64} {
  func.func @_matmul_kernel(%arg0: i32, %arg1: i32, %arg2: i32, %arg3: memref<32x128xbf16, #tpu.memory_space<vmem>>, %arg4: memref<128x32xbf16, #tpu.memory_space<vmem>>, %arg5: memref<1x32xf32, #tpu.memory_space<vmem>>, %arg6: memref<32x32xbf16, #tpu.memory_space<vmem>>, %arg7: memref<32x32xbf16, #tpu.memory_space<vmem>>, %arg8: memref<32x32xf32, #tpu.memory_space<vmem>>) attributes {dimension_semantics = [#tpu.dimension_semantics<parallel>, #tpu.dimension_semantics<parallel>, #tpu.dimension_semantics<arbitrary>], iteration_bounds = array<i64: 1, 1, 1>, scalar_prefetch = 0 : i64, scratch_operands = 1 : i64, tpu.core_type = #tpu.core_type<tc>, window_params = [{transform_indices = @transform_0, window_bounds = array<i64: 32, 128>}, {transform_indices = @transform_1, window_bounds = array<i64: 128, 32>}, {transform_indices = @transform_2, window_bounds = array<i64: 1, 32>}, {transform_indices = @transform_3, window_bounds = array<i64: 32, 32>}, {transform_indices = @transform_4, window_bounds = array<i64: 32, 32>}]} {
    %c0_i32 = arith.constant 0 : i32
    %0 = arith.cmpi eq, %arg2, %c0_i32 : i32
    %1 = arith.extui %0 : i1 to i32
    %c0_i32_0 = arith.constant 0 : i32
    %2 = arith.cmpi ne, %1, %c0_i32_0 : i32
    scf.if %2 {
      %cst_10 = arith.constant 0.000000e+00 : f32
      %12 = vector.broadcast %cst_10 : f32 to vector<32x32xf32>
      %c0_11 = arith.constant 0 : index
      %c0_12 = arith.constant 0 : index
      %13 = vector.load %arg8[%c0_11, %c0_12] : memref<32x32xf32, #tpu.memory_space<vmem>>, vector<32x32xf32>
      tpu.vector_store %arg8[%c0_11, %c0_12], %12 {strides = array<i32>} : memref<32x32xf32, #tpu.memory_space<vmem>>, vector<32x32xf32>,
    } else {
    }
    %c0 = arith.constant 0 : index
    %c0_1 = arith.constant 0 : index
    %3 = vector.load %arg8[%c0, %c0_1] : memref<32x32xf32, #tpu.memory_space<vmem>>, vector<32x32xf32>
    %c0_2 = arith.constant 0 : index
    %c0_3 = arith.constant 0 : index
    %4 = vector.load %arg3[%c0_2, %c0_3] : memref<32x128xbf16, #tpu.memory_space<vmem>>, vector<32x128xbf16>
    %c0_4 = arith.constant 0 : index
    %c0_5 = arith.constant 0 : index
    %5 = vector.load %arg4[%c0_4, %c0_5] : memref<128x32xbf16, #tpu.memory_space<vmem>>, vector<128x32xbf16>
    %cst = arith.constant dense<0.000000e+00> : vector<32x32xf32>
    %6 = tpu.matmul %4, %5, %cst {dimension_numbers = #tpu.dot_dimension_numbers<[1], [0], [0], [1], [0, 0, 1, 1], [], []>} : vector<32x128xbf16>, vector<128x32xbf16>, vector<32x32xf32> -> vector<32x32xf32>
    %7 = arith.addf %3, %6 : vector<32x32xf32>
    %c0_6 = arith.constant 0 : index
    %c0_7 = arith.constant 0 : index
    %8 = vector.load %arg8[%c0_6, %c0_7] : memref<32x32xf32, #tpu.memory_space<vmem>>, vector<32x32xf32>
    tpu.vector_store %arg8[%c0_6, %c0_7], %7 {strides = array<i32>} : memref<32x32xf32, #tpu.memory_space<vmem>>, vector<32x32xf32>,
    %c0_i32_8 = arith.constant 0 : i32
    %9 = arith.cmpi eq, %arg2, %c0_i32_8 : i32
    %10 = arith.extui %9 : i1 to i32
    %c0_i32_9 = arith.constant 0 : i32
    %11 = arith.cmpi ne, %10, %c0_i32_9 : i32
    scf.if %11 {
      %c0_10 = arith.constant 0 : index
      %c0_11 = arith.constant 0 : index
      %12 = vector.load %arg8[%c0_10, %c0_11] : memref<32x32xf32, #tpu.memory_space<vmem>>, vector<32x32xf32>
      %c0_12 = arith.constant 0 : index
      %c0_13 = arith.constant 0 : index
      %13 = vector.load %arg5[%c0_12, %c0_13] : memref<1x32xf32, #tpu.memory_space<vmem>>, vector<1x32xf32>
      %14 = vector.broadcast %13 : vector<1x32xf32> to vector<32x32xf32>
      %15 = arith.addf %12, %14 : vector<32x32xf32>
      %c0_14 = arith.constant 0 : index
      %c0_15 = arith.constant 0 : index
      %16 = vector.load %arg6[%c0_14, %c0_15] : memref<32x32xbf16, #tpu.memory_space<vmem>>, vector<32x32xbf16>
      %17 = arith.extf %16 : vector<32x32xbf16> to vector<32x32xf32>
      %18 = arith.addf %15, %17 : vector<32x32xf32>
      %19 = arith.truncf %18 : vector<32x32xf32> to vector<32x32xbf16>
      %c0_16 = arith.constant 0 : index
      %c0_17 = arith.constant 0 : index
      %20 = vector.load %arg7[%c0_16, %c0_17] : memref<32x32xbf16, #tpu.memory_space<vmem>>, vector<32x32xbf16>
      tpu.vector_store %arg7[%c0_16, %c0_17], %19 {strides = array<i32>} : memref<32x32xbf16, #tpu.memory_space<vmem>>, vector<32x32xbf16>,
    } else {
    }
    return
  }
  func.func @transform_0(%arg0: i32, %arg1: i32, %arg2: i32) -> (i32, i32) {
    %c0_i32 = arith.constant 0 : i32
    return %arg0, %arg2 : i32, i32
  }
  func.func @transform_1(%arg0: i32, %arg1: i32, %arg2: i32) -> (i32, i32) {
    %c0_i32 = arith.constant 0 : i32
    return %arg2, %arg1 : i32, i32
  }
  func.func @transform_2(%arg0: i32, %arg1: i32, %arg2: i32) -> (i32, i32) {
    %c0_i32 = arith.constant 0 : i32
    %c0_i32_0 = arith.constant 0 : i32
    return %c0_i32, %arg1 : i32, i32
  }
  func.func @transform_3(%arg0: i32, %arg1: i32, %arg2: i32) -> (i32, i32) {
    %c0_i32 = arith.constant 0 : i32
    return %arg0, %arg1 : i32, i32
  }
  func.func @transform_4(%arg0: i32, %arg1: i32, %arg2: i32) -> (i32, i32) {
    %c0_i32 = arith.constant 0 : i32
    return %arg0, %arg1 : i32, i32
  }
}

module attributes {stable_mosaic.version = 11 : i64} {
  func.func @_norm_matmul_kernel(%arg0: i32, %arg1: i32, %arg2: i32, %arg3: memref<1x16x32xbf16, #tpu.memory_space<vmem>>, %arg4: memref<1x1x32xf32, #tpu.memory_space<vmem>>, %arg5: memref<1x1x32xf32, #tpu.memory_space<vmem>>, %arg6: memref<32x32xbf16, #tpu.memory_space<vmem>>, %arg7: memref<1x32xf32, #tpu.memory_space<vmem>>, %arg8: memref<1x16x32xf32, #tpu.memory_space<vmem>>, %arg9: memref<16x32xbf16, #tpu.memory_space<vmem>>) attributes {dimension_semantics = [#tpu.dimension_semantics<parallel>, #tpu.dimension_semantics<parallel>, #tpu.dimension_semantics<arbitrary>], iteration_bounds = array<i64: 2, 1, 1>, scalar_prefetch = 0 : i64, scratch_operands = 1 : i64, tpu.core_type = #tpu.core_type<tc>, window_params = [{transform_indices = @transform_0, window_bounds = array<i64: 1, 16, 32>}, {transform_indices = @transform_1, window_bounds = array<i64: 1, 1, 32>}, {transform_indices = @transform_2, window_bounds = array<i64: 1, 1, 32>}, {transform_indices = @transform_3, window_bounds = array<i64: 32, 32>}, {transform_indices = @transform_4, window_bounds = array<i64: 1, 32>}, {transform_indices = @transform_5, window_bounds = array<i64: 1, 16, 32>}]} {
    %c0_i32 = arith.constant 0 : i32
    %0 = arith.cmpi eq, %arg2, %c0_i32 : i32
    %1 = arith.extui %0 : i1 to i32
    %c0_i32_0 = arith.constant 0 : i32
    %2 = arith.cmpi ne, %1, %c0_i32_0 : i32
    scf.if %2 {
      %c0_9 = arith.constant 0 : index
      %c0_10 = arith.constant 0 : index
      %c0_11 = arith.constant 0 : index
      %12 = vector.load %arg3[%c0_9, %c0_10, %c0_11] : memref<1x16x32xbf16, #tpu.memory_space<vmem>>, vector<1x16x32xbf16>
      %13 = vector.shape_cast %12 : vector<1x16x32xbf16> to vector<16x32xbf16>
      %14 = arith.extf %13 : vector<16x32xbf16> to vector<16x32xf32>
      %cst_12 = arith.constant dense<0.000000e+00> : vector<16xf32>
      %15 = vector.multi_reduction <add>, %14, %cst_12 [1] : vector<16x32xf32> to vector<16xf32>
      %16 = vector.shape_cast %15 : vector<16xf32> to vector<16x1xf32>
      %cst_13 = arith.constant 3.200000e+01 : f32
      %17 = vector.broadcast %cst_13 : f32 to vector<16x1xf32>
      %18 = arith.divf %16, %17 : vector<16x1xf32>
      %19 = vector.broadcast %18 : vector<16x1xf32> to vector<16x32xf32>
      %20 = arith.subf %14, %19 : vector<16x32xf32>
      %21 = arith.mulf %20, %20 : vector<16x32xf32>
      %cst_14 = arith.constant dense<0.000000e+00> : vector<16xf32>
      %22 = vector.multi_reduction <add>, %21, %cst_14 [1] : vector<16x32xf32> to vector<16xf32>
      %23 = vector.shape_cast %22 : vector<16xf32> to vector<16x1xf32>
      %cst_15 = arith.constant 3.200000e+01 : f32
      %24 = vector.broadcast %cst_15 : f32 to vector<16x1xf32>
      %25 = arith.divf %23, %24 : vector<16x1xf32>
      %26 = vector.broadcast %18 : vector<16x1xf32> to vector<16x32xf32>
      %27 = arith.subf %14, %26 : vector<16x32xf32>
      %cst_16 = arith.constant 9.99999974E-6 : f32
      %28 = vector.broadcast %cst_16 : f32 to vector<16x1xf32>
      %29 = arith.addf %25, %28 : vector<16x1xf32>
      %30 = math.rsqrt %29 : vector<16x1xf32>
      %31 = vector.broadcast %30 : vector<16x1xf32> to vector<16x32xf32>
      %32 = arith.mulf %27, %31 : vector<16x32xf32>
      %c0_17 = arith.constant 0 : index
      %c0_18 = arith.constant 0 : index
      %c0_19 = arith.constant 0 : index
      %33 = vector.load %arg4[%c0_17, %c0_18, %c0_19] : memref<1x1x32xf32, #tpu.memory_space<vmem>>, vector<1x1x32xf32>
      %34 = vector.shape_cast %33 : vector<1x1x32xf32> to vector<1x32xf32>
      %c0_20 = arith.constant 0 : index
      %c0_21 = arith.constant 0 : index
      %c0_22 = arith.constant 0 : index
      %35 = vector.load %arg5[%c0_20, %c0_21, %c0_22] : memref<1x1x32xf32, #tpu.memory_space<vmem>>, vector<1x1x32xf32>
      %36 = vector.shape_cast %35 : vector<1x1x32xf32> to vector<1x32xf32>
      %37 = vector.broadcast %34 : vector<1x32xf32> to vector<16x32xf32>
      %38 = arith.mulf %37, %32 : vector<16x32xf32>
      %39 = vector.broadcast %36 : vector<1x32xf32> to vector<16x32xf32>
      %40 = arith.addf %38, %39 : vector<16x32xf32>
      %41 = arith.truncf %40 : vector<16x32xf32> to vector<16x32xbf16>
      %c0_23 = arith.constant 0 : index
      %c0_24 = arith.constant 0 : index
      %42 = vector.load %arg9[%c0_23, %c0_24] : memref<16x32xbf16, #tpu.memory_space<vmem>>, vector<16x32xbf16>
      tpu.vector_store %arg9[%c0_23, %c0_24], %41 {strides = array<i32>} : memref<16x32xbf16, #tpu.memory_space<vmem>>, vector<16x32xbf16>,
    } else {
    }
    %c0 = arith.constant 0 : index
    %c0_1 = arith.constant 0 : index
    %3 = vector.load %arg9[%c0, %c0_1] : memref<16x32xbf16, #tpu.memory_space<vmem>>, vector<16x32xbf16>
    %c0_2 = arith.constant 0 : index
    %c0_3 = arith.constant 0 : index
    %4 = vector.load %arg6[%c0_2, %c0_3] : memref<32x32xbf16, #tpu.memory_space<vmem>>, vector<32x32xbf16>
    %cst = arith.constant dense<0.000000e+00> : vector<16x32xf32>
    %5 = tpu.matmul %3, %4, %cst {dimension_numbers = #tpu.dot_dimension_numbers<[1], [0], [0], [1], [0, 0, 1, 1], [], []>} : vector<16x32xbf16>, vector<32x32xbf16>, vector<16x32xf32> -> vector<16x32xf32>
    %c0_4 = arith.constant 0 : index
    %c0_5 = arith.constant 0 : index
    %6 = vector.load %arg7[%c0_4, %c0_5] : memref<1x32xf32, #tpu.memory_space<vmem>>, vector<1x32xf32>
    %7 = vector.broadcast %6 : vector<1x32xf32> to vector<16x32xf32>
    %8 = arith.addf %5, %7 : vector<16x32xf32>
    %c0_6 = arith.constant 0 : index
    %c0_7 = arith.constant 0 : index
    %c0_8 = arith.constant 0 : index
    %9 = vector.load %arg8[%c0_6, %c0_7, %c0_8] : memref<1x16x32xf32, #tpu.memory_space<vmem>>, vector<1x16x32xf32>
    %10 = vector.shape_cast %9 : vector<1x16x32xf32> to vector<16x32xf32>
    %11 = vector.shape_cast %8 : vector<16x32xf32> to vector<1x16x32xf32>
    tpu.vector_store %arg8[%c0_6, %c0_7, %c0_8], %11 {strides = array<i32>} : memref<1x16x32xf32, #tpu.memory_space<vmem>>, vector<1x16x32xf32>,
    return
  }
  func.func @transform_0(%arg0: i32, %arg1: i32, %arg2: i32) -> (i32, i32, i32) {
    %c0_i32 = arith.constant 0 : i32
    %c0_i32_0 = arith.constant 0 : i32
    return %arg0, %arg1, %c0_i32 : i32, i32, i32
  }
  func.func @transform_1(%arg0: i32, %arg1: i32, %arg2: i32) -> (i32, i32, i32) {
    %c0_i32 = arith.constant 0 : i32
    %c0_i32_0 = arith.constant 0 : i32
    %c0_i32_1 = arith.constant 0 : i32
    return %arg0, %c0_i32, %c0_i32_0 : i32, i32, i32
  }
  func.func @transform_2(%arg0: i32, %arg1: i32, %arg2: i32) -> (i32, i32, i32) {
    %c0_i32 = arith.constant 0 : i32
    %c0_i32_0 = arith.constant 0 : i32
    %c0_i32_1 = arith.constant 0 : i32
    return %arg0, %c0_i32, %c0_i32_0 : i32, i32, i32
  }
  func.func @transform_3(%arg0: i32, %arg1: i32, %arg2: i32) -> (i32, i32) {
    %c0_i32 = arith.constant 0 : i32
    %c0_i32_0 = arith.constant 0 : i32
    return %c0_i32, %arg2 : i32, i32
  }
  func.func @transform_4(%arg0: i32, %arg1: i32, %arg2: i32) -> (i32, i32) {
    %c0_i32 = arith.constant 0 : i32
    %c0_i32_0 = arith.constant 0 : i32
    return %c0_i32, %arg2 : i32, i32
  }
  func.func @transform_5(%arg0: i32, %arg1: i32, %arg2: i32) -> (i32, i32, i32) {
    %c0_i32 = arith.constant 0 : i32
    return %arg0, %arg1, %arg2 : i32, i32, i32
  }
}

</mosaic_0001>

<bundles_post_ra>
// kernel: dit_forward.19
= control target key start
LH: loop header
LB: loop body
LE: loop exit
PB: predicated region body
PF: predicated region fallthrough
CT: control target
= control target key end

     0   :  { %v120_v0 = vmov 0.0   ;;  %vm121_vm0 = vmmov 0   ;;  %vm38_vm1 = vcmask 261120   ;;  %s157_s1 = inlined_call_operand.vmem [shape: bf16[32,128], index: 1, kind: input, shape index: {}]   ;;  %s158_s0 = inlined_call_operand.vmem [shape: bf16[2,32], index: 0, kind: input, shape index: {}]   ;;  %s159_s2 = inlined_call_operand.vmem [shape: f32[1,128], index: 2, kind: input, shape index: {}]   ;;  %s160_s3 = inlined_call_operand.vmem [shape: f32[2,128], index: 3, kind: output, shape index: {}]  }
   0x1   :  { %108 = vmatprep.subr.bf16.mxu0 %v120_v0  ;;  %19 = vst [vmem:[#allocation2] sm:$0x3] %v120_v0  ;;  %v118_v1 = vld [vmem:[%s157_s1] sm:$0xff]   ;;  %112 = vmatprep.mubr.msk.bf16.mxu0 %vm121_vm0, %v120_v0  ;;  %v119_v2 = vld [vmem:[%s157_s1 + $0x8] sm:$0xff]  }
   0x2   :  { %109 = vmatpush3.bf16.msra.mxu0 %v118_v1  ;;  %v21_v3 = vld [vmem:[%s158_s0] sm:$0x1] }
   0x3   :  { %110 = vmatprep.subr.bf16.mxu0 %v120_v0  ;;  %v104_v10 = vld [vmem:[%s159_s2] ss:$0 sm:$0xff] }
   0x6   :  { %111 = vmatpush3.bf16.msra.mxu0 %v119_v2 }
   0x8   :  { %v20_v4 = vld [vmem:[#allocation2] sm:$0x3] }
   0x9   :  { %113 = vmatmul.mubr.msk.bf16.vlgmr.msra.gmra.mrb[0].mxu0 %vm38_vm1, %v21_v3 }
  0xdc   :  { %v76_v5 = vpop.f32.mrb[0].mxu0 }
  0xdd   :  { %v82_v6 = vadd.f32 %v76_v5, %v20_v4  ;;  %v114_v7 = vpop.f32.mrb[1].mxu0 }
  0xde   :  { %v79_v8 = vpop.f32.mrb[2].mxu0 }
  0xdf   :  { %83 = vst [vmem:[#allocation2] sm:$0x3] %v82_v6  ;;  %v115_v9 = vpop.f32.mrb[3].mxu0 }
  0xe6   :  { %v87_v11 = vld [vmem:[#allocation2] sm:$0x3] }
  0xe7   :  { %v95_v12 = vadd.f32 %v104_v10, %v87_v11 }
  0xe9   :  { %96 = vst [vmem:[%s160_s3] sm:$0x3] %v95_v12 }

// kernel: dit_forward.18
= control target key start
LH: loop header
LB: loop body
LE: loop exit
PB: predicated region body
PF: predicated region fallthrough
CT: control target
= control target key end

     0   :  { %vm19_vm0 = vcmask 254976   ;;  %v197_v0 = vmov 0.0   ;;  %vm198_vm1 = vmmov 0   ;;  %vm143_vm2 = vcmask 253952   ;;  %s254_s1 = inlined_call_operand.vmem [shape: bf16[128,32], index: 1, kind: input, shape index: {}]   ;;  %s255_s0 = inlined_call_operand.vmem [shape: bf16[2,128], index: 0, kind: input, shape index: {}]   ;;  %s256_s2 = inlined_call_operand.vmem [shape: f32[1,32], index: 2, kind: input, shape index: {}]   ;;  %s257_s3 = inlined_call_operand.vmem [shape: bf16[2,32], index: 3, kind: output, shape index: {}]  }
   0x1   :  { %167 = vmatprep.subr.bf16.mxu0 %v197_v0  ;;  %v189_v1 = vld [vmem:[%s254_s1] sm:$0xff]   ;;  %183 = vmatprep.mubr.msk.bf16.mxu0 %vm198_vm1, %v197_v0  ;;  %20 = vst.msk [vmem:[#allocation2] sm:$0x3] %vm19_vm0, %v197_v0  ;;  %v190_v2 = vld [vmem:[%s254_s1 + $0x8] sm:$0xff]   ;;  %v191_v3 = vld [vmem:[%s254_s1 + $0x10] sm:$0xff]  }
   0x2   :  { %168 = vmatpush3.bf16.msra.mxu0 %v189_v1  ;;  %v192_v4 = vld [vmem:[%s254_s1 + $0x18] sm:$0xff]   ;;  %v193_v5 = vld [vmem:[%s254_s1 + $0x20] sm:$0xff]   ;;  %v194_v6 = vld [vmem:[%s254_s1 + $0x28] sm:$0xff]  }
   0x3   :  { %169 = vmatprep.subr.bf16.mxu0 %v197_v0  ;;  %v195_v7 = vld [vmem:[%s254_s1 + $0x30] sm:$0xff]   ;;  %v196_v8 = vld [vmem:[%s254_s1 + $0x38] sm:$0xff]   ;;  %v22_v9 = vld [vmem:[%s255_s0] sm:$0x1] }
   0x4   :  { %v157_v16 = vld [vmem:[%s256_s2] ss:$0 sm:$0xff] }
   0x6   :  { %170 = vmatpush3.bf16.msra.mxu0 %v190_v2 }
   0x7   :  { %171 = vmatprep.subr.bf16.mxu0 %v197_v0 }
   0x8   :  { %v21_v10 = vld [vmem:[#allocation2] sm:$0x3] }
   0xa   :  { %172 = vmatpush3.bf16.msra.mxu0 %v191_v3 }
   0xb   :  { %173 = vmatprep.subr.bf16.mxu0 %v197_v0 }
   0xe   :  { %174 = vmatpush3.bf16.msra.mxu0 %v192_v4 }
   0xf   :  { %175 = vmatprep.subr.bf16.mxu0 %v197_v0 }
  0x12   :  { %176 = vmatpush3.bf16.msra.mxu0 %v193_v5 }
  0x13   :  { %177 = vmatprep.subr.bf16.mxu0 %v197_v0 }
  0x16   :  { %178 = vmatpush3.bf16.msra.mxu0 %v194_v6 }
  0x17   :  { %179 = vmatprep.subr.bf16.mxu0 %v197_v0 }
  0x1a   :  { %180 = vmatpush3.bf16.msra.mxu0 %v195_v7 }
  0x1b   :  { %181 = vmatprep.subr.bf16.mxu0 %v197_v0 }
  0x1e   :  { %182 = vmatpush3.bf16.msra.mxu0 %v196_v8 }
  0x21   :  { %184 = vmatmul.mubr.bf16.vlgmr.msra.gmra.mrb[0].mxu0 %v22_v9 }
  0xf4   :  { %v121_v11 = vpop.f32.mrb[0].mxu0 }
  0xf5   :  { %v127_v12 = vadd.f32 %v121_v11, %v21_v10  ;;  %v185_v13 = vpop.f32.mrb[1].mxu0 }
  0xf6   :  { %v124_v14 = vpop.f32.mrb[2].mxu0 }
  0xf7   :  { %129 = vst.msk [vmem:[#allocation2] sm:$0x3] %vm19_vm0, %v127_v12  ;;  %v186_v15 = vpop.f32.mrb[3].mxu0 }
  0xfe   :  { %v133_v17 = vld [vmem:[#allocation2] sm:$0x3] }
  0xff   :  { %v141_v18 = vadd.f32 %v157_v16, %v133_v17 }
 0x101   :  { %v142_v19 = vpack.c.bf16 %v141_v18, %v141_v18 }
 0x103   :  { %144 = vst.msk [vmem:[%s257_s3] sm:$0x1] %vm143_vm2, %v142_v19 }

// kernel: dit_forward.17
= control target key start
LH: loop header
LB: loop body
LE: loop exit
PB: predicated region body
PF: predicated region fallthrough
CT: control target
= control target key end

     0   :  { %v133_v0 = vmov 0.0   ;;  %vm134_vm0 = vmmov 0   ;;  %vm38_vm1 = vcmask 261120   ;;  %s170_s1 = inlined_call_operand.vmem [shape: bf16[32,128], index: 1, kind: input, shape index: {}]   ;;  %s171_s0 = inlined_call_operand.vmem [shape: bf16[2,32], index: 0, kind: input, shape index: {}]   ;;  %s172_s2 = inlined_call_operand.vmem [shape: f32[1,128], index: 2, kind: input, shape index: {}]   ;;  %s173_s3 = inlined_call_operand.vmem [shape: bf16[2,128], index: 3, kind: output, shape index: {}]  }
   0x1   :  { %117 = vmatprep.subr.bf16.mxu0 %v133_v0  ;;  %19 = vst [vmem:[#allocation2] sm:$0x3] %v133_v0  ;;  %v127_v1 = vld [vmem:[%s170_s1] sm:$0xff]   ;;  %121 = vmatprep.mubr.msk.bf16.mxu0 %vm134_vm0, %v133_v0  ;;  %v128_v2 = vld [vmem:[%s170_s1 + $0x8] sm:$0xff]  }
   0x2   :  { %118 = vmatpush3.bf16.msra.mxu0 %v127_v1  ;;  %v21_v3 = vld [vmem:[%s171_s0] sm:$0x1] }
   0x3   :  { %119 = vmatprep.subr.bf16.mxu0 %v133_v0  ;;  %v112_v10 = vld [vmem:[%s172_s2] ss:$0 sm:$0xff] }
   0x6   :  { %120 = vmatpush3.bf16.msra.mxu0 %v128_v2 }
   0x8   :  { %v20_v4 = vld [vmem:[#allocation2] sm:$0x3] }
   0x9   :  { %122 = vmatmul.mubr.msk.bf16.vlgmr.msra.gmra.mrb[0].mxu0 %vm38_vm1, %v21_v3 }
  0xdc   :  { %v76_v5 = vpop.f32.mrb[0].mxu0 }
  0xdd   :  { %v82_v6 = vadd.f32 %v76_v5, %v20_v4  ;;  %v123_v7 = vpop.f32.mrb[1].mxu0 }
  0xde   :  { %v79_v8 = vpop.f32.mrb[2].mxu0 }
  0xdf   :  { %83 = vst [vmem:[#allocation2] sm:$0x3] %v82_v6  ;;  %v124_v9 = vpop.f32.mrb[3].mxu0 }
  0xe6   :  { %v87_v11 = vld [vmem:[#allocation2] sm:$0x3] }
  0xe7   :  { %v95_v12 = vadd.f32 %v112_v10, %v87_v11 }
  0xe9   :  { %v113_v13 = vmul.f32 -1.442695, %v95_v12 }
  0xeb   :  { %129 = vpow2.f32 %v113_v13 }
  0xf5   :  { %v130_v14 = vpop.eup %129 }
  0xf6   :  { %v99_v15 = vadd.f32 1.0, %v130_v14 }
  0xf8   :  { %131 = vrcp.f32 %v99_v15 }
 0x102   :  { %v132_v16 = vpop.eup %131 }
 0x103   :  { %v102_v17 = vmul.f32 %v132_v16, %v95_v12 }
 0x105   :  { %v103_v18 = vpack.c.bf16 %v102_v17, %v102_v17 }
 0x107   :  { %104 = vst [vmem:[%s173_s3] sm:$0x1] %v103_v18 }

// kernel: dit_forward.16
= control target key start
LH: loop header
LB: loop body
LE: loop exit
PB: predicated region body
PF: predicated region fallthrough
CT: control target
= control target key end

     0   :  { %s687_s15 = smov 0   ;;  %s689_s16 = smov 0   ;;  %s735_s0 = inlined_call_operand.vmem [shape: bf16[2,16,48], index: 0, kind: input, shape index: {}]   ;;  %s736_s1 = inlined_call_operand.vmem [shape: bf16[48,32], index: 1, kind: input, shape index: {}]   ;;  %s737_s2 = inlined_call_operand.vmem [shape: f32[1,32], index: 2, kind: input, shape index: {}]   ;;  %s738_s3 = inlined_call_operand.vmem [shape: bf16[16,32], index: 3, kind: input, shape index: {}]   ;;  %s739_s4 = inlined_call_operand.vmem [shape: bf16[2,16,32], index: 4, kind: output, shape index: {}]  }
   0x1   :  { %s691_s17 = smov 0  }
   0x2 LB: > { %s33_s18 = sadd.s32 1, %s654_s16  ;;  %p569_p0 = scmp.ge.s32.totalorder %s658_s17, 1  ;;  %s658_s17 = sphi %s691_s17, %s14_s17   ;;  %s654_s16 = sphi %s689_s16, %s741_s16   ;;  %s650_s15 = sphi %s687_s15, %s740_s15  }
   0x3   : > { %p35_p1 = scmp.ge.s32.totalorder %s33_s18, 2  ;;  %p225_p2 = scmp.lt.s32.totalorder %s658_s17, 3 }
   0x5   : > { %s743_s18 = smov (%p35_p1, %s33_s18), 0  ;;  %p226_p3 = pnand %p569_p0, %p225_p2 }
   0x6   : > { %v632_v0 = vld [vmem:[%s736_s1] sm:$0xff] (!%p226_p3)   ;;  %v660_v1 = vmov (!%p226_p3), 0.0   ;;  %v633_v2 = vld [vmem:[%s736_s1 + $0x8] sm:$0xff] (!%p226_p3)   ;;  %vm661_vm0 = vmmov (!%p226_p3), 0   ;;  %p278_p4 = scmp.lt.s32.totalorder (!%p226_p3), %s650_s15, 1  ;;  %v634_v3 = vld [vmem:[%s736_s1 + $0x10] sm:$0xff] (!%p226_p3)  }
   0x7   : > { %229 = sbr.rel (%p226_p3) target bundleno = 240 (0xf0), region = 36  ;;  %596 = vmatprep.subr.bf16.mxu0 (!%p226_p3), %v660_v1  ;;  %602 = vmatprep.mubr.msk.bf16.mxu0 (!%p226_p3), %vm661_vm0, %v660_v1  ;;  %vm355_vm1 = vcmask (!%p226_p3), 392192   ;;  %v589_v5 = vld [vmem:[%s738_s3] sm:$0xff] (!%p226_p3)   ;;  %vm414_vm2 = vcmask (!%p226_p3), 257024  }
   0x8   : > { %597 = vmatpush3.bf16.msra.mxu0 (!%p226_p3), %v632_v0  ;;  %v574_v6 = vld [vmem:[%s737_s2] ss:$0 sm:$0xff] (!%p226_p3)  ;;  %v590_v7 = vunpack.c.l.bf16 (!%p226_p3), %v589_v5  ;;  %v591_v11 = vunpack.c.h.bf16 (!%p226_p3), %v589_v5 }
   0x9   : > { %598 = vmatprep.subr.bf16.mxu0 (!%p226_p3), %v660_v1 }
   0xc   : > { %599 = vmatpush3.bf16.msra.mxu0 (!%p226_p3), %v633_v2 }
   0xd   : > { %600 = vmatprep.subr.bf16.mxu0 (!%p226_p3), %v660_v1 }
   0xe   : > { %s745_s15 = smov (!%p278_p4, %s650_s15), 1 }
   0xf   : > { %s584_s25 = sshll.u32 %s745_s15, 3 }
  0x10   : > { %s285_s28 = scalar_lea.vmem %s735_s0, %s584_s25  ;;  %601 = vmatpush3.bf16.msra.mxu0 %v634_v3  ;;  %s314_s9 = scalar_lea.vmem %s739_s4, %s584_s25 }
  0x11   : > { %v635_v4 = vld [vmem:[%s285_s28] sm:$0xff]  }
  0x13   : > { %603 = vmatmul.mubr.msk.bf16.vlgmr.msra.gmra.mrb[0].mxu0 %vm355_vm1, %v635_v4 }
  0xe6   : > { %v393_v8 = vpop.f32.mrb[0].mxu0 }
  0xe7   : > { %v394_v9 = vadd.f32 %v574_v6, %v393_v8  ;;  %v604_v10 = vpop.f32.mrb[1].mxu0 }
  0xe8   : > { %v396_v12 = vpop.f32.mrb[2].mxu0 }
  0xe9   : > { %v404_v13 = vadd.f32 %v590_v7, %v394_v9  ;;  %v397_v14 = vadd.f32 %v574_v6, %v396_v12  ;;  %v605_v15 = vpop.f32.mrb[3].mxu0 }
  0xeb   : > { %v586_v16 = vpack.c.bf16 %v404_v13, %v404_v13  ;;  %v405_v17 = vadd.f32 %v591_v11, %v397_v14 }
  0xed   : > { %415 = vst.msk [vmem:[%s314_s9] sm:$0xf] %vm414_vm2, %v586_v16  ;;  %v587_v18 = vpack.c.bf16 %v405_v17, %v405_v17 }
  0xef   : > { %416 = vst.msk [vmem:[%s314_s9 + $0x4] sm:$0xf] %vm414_vm2, %v587_v18 }
  0xf0 PF: > { %s14_s17 = sadd.s32 1, %s658_s17   ;;  %s740_s15 = smov %s654_s16 }
  0xf1   : > { %p11_p5 = scmp.ge.s32.totalorder %s14_s17, 4   ;;  %s741_s16 = smov %s743_s18 }
  0xf3   :  { %13 = sbr.rel (!%p11_p5) target bundleno = 2 (0x2), region = 75 }

// kernel: dit_forward.20
= control target key start
LH: loop header
LB: loop body
LE: loop exit
PB: predicated region body
PF: predicated region fallthrough
CT: control target
= control target key end

     0   :  { %s748_s18 = smov 0   ;;  %s750_s19 = smov 0   ;;  %s811_s0 = inlined_call_operand.vmem [shape: bf16[2,16,32], index: 0, kind: input, shape index: {}]   ;;  %s812_s1 = inlined_call_operand.vmem [shape: f32[2,1,32], index: 1, kind: input, shape index: {}]   ;;  %s813_s2 = inlined_call_operand.vmem [shape: f32[2,1,32], index: 2, kind: input, shape index: {}]   ;;  %s814_s3 = inlined_call_operand.vmem [shape: bf16[32,96], index: 3, kind: input, shape index: {}]   ;;  %s815_s4 = inlined_call_operand.vmem [shape: f32[1,96], index: 4, kind: input, shape index: {}]   ;;  %s816_s5 = inlined_call_operand.vmem [shape: bf16[2,16,96], index: 5, kind: output, shape index: {}]  }
   0x1   :  { %s752_s20 = smov 0  }
   0x2 LB: > { %s34_s21 = sadd.s32 1, %s710_s19  ;;  %p626_p0 = scmp.ge.s32.totalorder %s714_s20, 1  ;;  %s714_s20 = sphi %s752_s20, %s15_s20   ;;  %s710_s19 = sphi %s750_s19, %s818_s19   ;;  %s706_s18 = sphi %s748_s18, %s817_s18  }
   0x3   : > { %p36_p1 = scmp.ge.s32.totalorder %s34_s21, 2  ;;  %p250_p2 = scmp.lt.s32.totalorder %s714_s20, 3 }
   0x5   : > { %s820_s21 = smov (%p36_p1, %s34_s21), 0  ;;  %p251_p3 = pnand %p626_p0, %p250_p2 }
   0x6   : > { %p303_p4 = scmp.lt.s32.totalorder (!%p251_p3), %s706_s18, 1  ;;  %vm347_vm0 = vcmask (!%p251_p3), 261120   ;;  %v686_v15 = vld [vmem:[%s814_s3] sm:$0xff] (!%p251_p3)   ;;  %v716_v16 = vmov (!%p251_p3), 0.0   ;;  %v687_v17 = vld [vmem:[%s814_s3 + $0x8] sm:$0xff] (!%p251_p3)   ;;  %vm717_vm1 = vmmov (!%p251_p3), 0  }
   0x7   : > { %254 = sbr.rel (%p251_p3) target bundleno = 566 (0x236), region = 40  ;;  %652 = vmatprep.subr.bf16.mxu0 (!%p251_p3), %v716_v16  ;;  %656 = vmatprep.mubr.msk.bf16.mxu0 (!%p251_p3), %vm717_vm1, %v716_v16  ;;  %v633_v36 = vld [vmem:[%s815_s4] ss:$0 sm:$0xff] (!%p251_p3)  ;;  %vm472_vm2 = vcmask (!%p251_p3), 781312  }
   0x8   : > { %653 = vmatpush3.bf16.msra.mxu0 (!%p251_p3), %v686_v15 }
   0x9   : > { %654 = vmatprep.subr.bf16.mxu0 (!%p251_p3), %v716_v16 }
   0xc   : > { %655 = vmatpush3.bf16.msra.mxu0 (!%p251_p3), %v687_v17 }
   0xe   : > { %s822_s18 = smov (!%p303_p4, %s706_s18), 1 }
   0xf   : > { %s641_s22 = sshll.u32 %s822_s18, 3  ;;  %s314_s7 = scalar_lea.vmem %s812_s1, %s822_s18 }
  0x10   : > { %s310_s25 = scalar_lea.vmem %s811_s0, %s641_s22  ;;  %v631_v26 = vld [vmem:[%s314_s7] ss:$0 sm:$0xff]  ;;  %s317_s10 = scalar_lea.vmem %s813_s2, %s822_s18 }
  0x11   : > { %v646_v0 = vld [vmem:[%s310_s25] sm:$0xff]   ;;  %s336_s15 = scalar_lea.vmem %s816_s5, %s641_s22 }
  0x12   : > { %v647_v1 = vunpack.c.l.bf16 %v646_v0  ;;  %v648_v2 = vunpack.c.h.bf16 %v646_v0  ;;  %v632_v30 = vld [vmem:[%s317_s10] ss:$0 sm:$0xff] }
  0x14   : > { %v348_v3 = vsel %vm347_vm0, %v647_v1, 0.0  ;;  %v351_v4 = vsel %vm347_vm0, %v648_v2, 0.0 }
  0x15   : > { %349 = vadd.xlane.f32.xlu0 %v348_v3 }
  0x19   : > { %352 = vadd.xlane.f32.xlu0 %v351_v4 }
  0xa2   : > { %v350_v5 = vpop.xlane.xlu0 %349 }
  0xa3   : > { %v355_v6 = vmul.f32 0.03125, %v350_v5 }
  0xa5   : > { %v357_v7 = vsub.f32 %v647_v1, %v355_v6 }
  0xa6   : > { %v353_v8 = vpop.xlane.xlu0 %352 }
  0xa7   : > { %v356_v9 = vmul.f32 0.03125, %v353_v8  ;;  %v359_v10 = vmul.f32 %v357_v7, %v357_v7 }
  0xa9   : > { %v358_v11 = vsub.f32 %v648_v2, %v356_v9  ;;  %v361_v12 = vsel %vm347_vm0, %v359_v10, 0.0 }
  0xaa   : > { %362 = vadd.xlane.f32.xlu1 %v361_v12 }
  0xab   : > { %v360_v13 = vmul.f32 %v358_v11, %v358_v11 }
  0xad   : > { %v364_v14 = vsel %vm347_vm0, %v360_v13, 0.0 }
  0xae   : > { %365 = vadd.xlane.f32.xlu1 %v364_v14 }
 0x137   : > { %v363_v18 = vpop.xlane.xlu1 %362 }
 0x138   : > { %v367_v19 = vmul.f32 0.03125, %v363_v18 }
 0x13a   : > { %v369_v20 = vadd.f32 1e-06, %v367_v19 }
 0x13b   : > { %v366_v21 = vpop.xlane.xlu1 %365 }
 0x13c   : > { %688 = vrsqrt.f32 %v369_v20  ;;  %v368_v22 = vmul.f32 0.03125, %v366_v21 }
 0x13e   : > { %v370_v23 = vadd.f32 1e-06, %v368_v22 }
 0x140   : > { %690 = vrsqrt.f32 %v370_v23 }
 0x146   : > { %v689_v24 = vpop.eup %688 }
 0x147   : > { %v373_v25 = vmul.f32 %v689_v24, %v357_v7 }
 0x149   : > { %v383_v28 = vmul.f32 %v631_v26, %v373_v25 }
 0x14a   : > { %v691_v27 = vpop.eup %690 }
 0x14b   : > { %v374_v29 = vmul.f32 %v691_v27, %v358_v11  ;;  %v391_v32 = vadd.f32 %v632_v30, %v383_v28 }
 0x14d   : > { %v384_v31 = vmul.f32 %v631_v26, %v374_v29 }
 0x14f   : > { %v392_v33 = vadd.f32 %v632_v30, %v384_v31 }
 0x151   : > { %v393_v34 = vpack.c.bf16 %v392_v33, %v391_v32 }
 0x153   : > { %394 = vst.msk [vmem:[#allocation2] sm:$0xff] %vm347_vm0, %v393_v34 }
 0x15a   : > { %v395_v35 = vld [vmem:[#allocation2] sm:$0xff] }
 0x15b   : > { %657 = vmatmul.mubr.msk.bf16.vlgmr.msra.gmra.mrb[0].mxu0 %vm347_vm0, %v395_v35 }
 0x22e   : > { %v457_v37 = vpop.f32.mrb[0].mxu0 }
 0x22f   : > { %v458_v38 = vadd.f32 %v633_v36, %v457_v37  ;;  %v658_v39 = vpop.f32.mrb[1].mxu0 }
 0x230   : > { %v460_v40 = vpop.f32.mrb[2].mxu0 }
 0x231   : > { %v643_v41 = vpack.c.bf16 %v458_v38, %v458_v38  ;;  %v461_v42 = vadd.f32 %v633_v36, %v460_v40  ;;  %v659_v43 = vpop.f32.mrb[3].mxu0 }
 0x233   : > { %473 = vst.msk [vmem:[%s336_s15] sm:$0xf] %vm472_vm2, %v643_v41  ;;  %v644_v44 = vpack.c.bf16 %v461_v42, %v461_v42 }
 0x235   : > { %474 = vst.msk [vmem:[%s336_s15 + $0x4] sm:$0xf] %vm472_vm2, %v644_v44 }
 0x236 PF: > { %s15_s20 = sadd.s32 1, %s714_s20   ;;  %s817_s18 = smov %s710_s19 }
 0x237   : > { %p12_p5 = scmp.ge.s32.totalorder %s15_s20, 4   ;;  %s818_s19 = smov %s820_s21 }
 0x239   :  { %14 = sbr.rel (!%p12_p5) target bundleno = 2 (0x2), region = 86 }

// kernel: dit_forward.21
= control target key start
LH: loop header
LB: loop body
LE: loop exit
PB: predicated region body
PF: predicated region fallthrough
CT: control target
= control target key end

     0   :  { %s769_s12 = smov 0   ;;  %s771_s13 = smov 0   ;;  %s847_s0 = inlined_call_operand.vmem [shape: bf16[24,16,8], index: 0, kind: input, shape index: {}, may-alias: {0,1,2}]   ;;  %s848_s1 = inlined_call_operand.vmem [shape: bf16[24,16,8], index: 1, kind: input, shape index: {}, may-alias: {0,1,2}]   ;;  %s849_s2 = inlined_call_operand.vmem [shape: bf16[24,16,8], index: 2, kind: input, shape index: {}, may-alias: {0,1,2}]   ;;  %s850_s3 = inlined_call_operand.vmem [shape: bf16[8,16,8], index: 3, kind: output, shape index: {}]  }
   0x1   :  { %s773_s14 = smov 0   ;;  %s775_s15 = smov 0  }
   0x2   :  { %s777_s16 = smov 0  }
   0x3 LB: > { %s28_s17 = sadd.s32 1, %s737_s14  ;;  %s32_s18 = sadd.s32 1, %s741_s15  ;;  %s745_s16 = sphi %s777_s16, %s13_s16   ;;  %s741_s15 = sphi %s775_s15, %s854_s15   ;;  %s737_s14 = sphi %s773_s14, %s853_s14   ;;  %s733_s13 = sphi %s771_s13, %s852_s13   ;;  %s729_s12 = sphi %s769_s12, %s851_s12  }
   0x4   : > { %p30_p0 = scmp.ge.s32.totalorder %s28_s17, 4  ;;  %p611_p1 = scmp.ge.s32.totalorder %s745_s16, 1 }
   0x5   : > { %p221_p2 = scmp.lt.s32.totalorder %s745_s16, 9 }
   0x6   : > { %s856_s17 = smov (%p30_p0, %s28_s17), 0  ;;  %s858_s18 = smov (!%p30_p0, %s32_s18), %s741_s15 }
   0x7   : > { %p222_p3 = pnand %p611_p1, %p221_p2  ;;  %p34_p4 = scmp.ge.s32.totalorder %s858_s18, 2 }
   0x8   : > { %s801_s19 = sshll.u32 (!%p222_p3), %s733_s13, 2  ;;  %v747_v0 = vmov (!%p222_p3), 0.0   ;;  %vm748_vm0 = vmmov (!%p222_p3), 0   ;;  %vm343_vm1 = vcmask (!%p222_p3), 64512   ;;  %vm391_vm2 = vcmask (!%p222_p3), 130048  }
   0x9   : > { %s860_s18 = smov (%p34_p4, %s858_s18), 0  ;;  %225 = sbr.rel (%p222_p3) target bundleno = 779 (0x30b), region = 32 }
   0xa   : > { %643 = vmatprep.subr.bf16.mxu0 (!%p222_p3), %v747_v0  ;;  %s805_s20 = sadd.s32 (!%p222_p3), %s729_s12, %s801_s19  ;;  %s288_s21 = sadd.s32 (!%p222_p3), 8, %s801_s19  ;;  %645 = vmatprep.mubr.msk.bf16.mxu0 (!%p222_p3), %vm748_vm0, %v747_v0  ;;  %vm473_vm3 = vcmask (!%p222_p3), 60416  }
   0xb   : > { %s289_s22 = sadd.s32 (!%p222_p3), %s729_s12, %s288_s21  ;;  %p276_p5 = scmp.lt.s32.totalorder (!%p222_p3), %s805_s20, 23  ;;  %649 = vmatprep.subr.bf16.mxu1 (!%p222_p3), %v747_v0  ;;  %651 = vmatprep.mubr.msk.bf16.mxu1 (!%p222_p3), %vm748_vm0, %v747_v0 }
   0xc   : > { %p290_p6 = scmp.lt.s32.totalorder (!%p222_p3), %s289_s22, 23  ;;  %s299_s5 = sadd.s32 (!%p222_p3), 16, %s801_s19 }
   0xd   : > { %s300_s6 = sadd.s32 (!%p222_p3), %s729_s12, %s299_s5  ;;  %p312_p8 = scmp.lt.s32.totalorder (!%p222_p3), %s805_s20, 7 }
   0xe   : > { %p301_p7 = scmp.lt.s32.totalorder (!%p222_p3), %s300_s6, 23 }
  0x10   : > { %s277_s23 = scalar_select %p276_p5, %s805_s20, 23 }
  0x11   : > { %s862_s22 = smov (!%p290_p6, %s289_s22), 23  ;;  %s864_s6 = smov (!%p301_p7, %s300_s6), 23 }
  0x12   : > { %s633_s24 = sshll.u32 %s277_s23, 3  ;;  %s634_s25 = sshll.u32 %s862_s22, 3 }
  0x13   : > { %s283_s28 = scalar_lea.vmem %s847_s0, %s633_s24  ;;  %s294_s4 = scalar_lea.vmem %s848_s1, %s634_s25 }
  0x14   : > { %v325_v1 = vld [vmem:[%s283_s28] sm:$0xf]  ;;  %v326_v2 = vld [vmem:[%s283_s28 + $0x4] sm:$0xf]  ;;  %s635_s7 = sshll.u32 %s864_s6, 3  ;;  %s866_s20 = smov (!%p312_p8, %s805_s20), 7 }
  0x15   : > { %v697_v3 = vld [vmem:[%s294_s4] sm:$0xff]   ;;  %v327_v5 = vmul.bf16 1052065461, %v325_v1  ;;  %v328_v6 = vmul.bf16 1052065461, %v326_v2  ;;  %s305_s10 = scalar_lea.vmem %s849_s2, %s635_s7  ;;  %s636_s11 = sshll.u32 %s866_s20, 3 }
  0x16   : > { %v348_v4 = vsel %vm343_vm1, %v697_v3, 0  ;;  %v698_v24 = vld [vmem:[%s305_s10] sm:$0xff]   ;;  %s319_s19 = scalar_lea.vmem %s850_s3, %s636_s11 }
  0x17   : > { %644 = vmatpush3.bf16.xpose.msra.mxu0 %v348_v4  ;;  %v624_v7 = vcombine.low %v327_v5, %v328_v6  ;;  %650 = vmatpush3.bf16.msra.mxu1 %v698_v24 }
  0x1e   : > { %646 = vmatmul.mubr.msk.bf16.vlgmr.msra.gmra.mrb[0].mxu0 %vm343_vm1, %v624_v7 }
  0xf1   : > { %v384_v8 = vpop.f32.mrb[0].mxu0 }
  0xf2   : > { %v647_v9 = vpop.f32.mrb[1].mxu0  ;;  %v392_v10 = vsel %vm391_vm2, %v384_v8, -inf }
  0xf3   : > { %393 = vmax.xlane.f32.xlu0 %v392_v10  ;;  %v387_v11 = vpop.f32.mrb[2].mxu0 }
  0xf4   : > { %v648_v12 = vpop.f32.mrb[3].mxu0  ;;  %v395_v13 = vsel %vm391_vm2, %v387_v11, -inf }
  0xf7   : > { %396 = vmax.xlane.f32.xlu0 %v395_v13 }
 0x180   : > { %v394_v14 = vpop.xlane.xlu0 %393 }
 0x181   : > { %v398_v15 = vsub.f32 %v384_v8, %v394_v14 }
 0x183   : > { %v400_v16 = vmul.f32 1.442695, %v398_v15 }
 0x184   : > { %v397_v17 = vpop.xlane.xlu0 %396 }
 0x185   : > { %699 = vpow2.f32 %v400_v16  ;;  %v399_v18 = vsub.f32 %v387_v11, %v397_v17 }
 0x187   : > { %v402_v19 = vmul.f32 1.442695, %v399_v18 }
 0x189   : > { %701 = vpow2.f32 %v402_v19 }
 0x18f   : > { %v700_v20 = vpop.eup %699 }
 0x190   : > { %v404_v21 = vsel %vm391_vm2, %v700_v20, 0.0 }
 0x191   : > { %405 = vadd.xlane.f32.xlu1 %v404_v21 }
 0x193   : > { %v702_v22 = vpop.eup %701 }
 0x194   : > { %v407_v23 = vsel %vm391_vm2, %v702_v22, 0.0 }
 0x195   : > { %408 = vadd.xlane.f32.xlu1 %v407_v23 }
 0x21e   : > { %v406_v25 = vpop.xlane.xlu1 %405 }
 0x21f   : > { %703 = vrcp.f32 %v406_v25 }
 0x222   : > { %v409_v26 = vpop.xlane.xlu1 %408 }
 0x223   : > { %705 = vrcp.f32 %v409_v26 }
 0x229   : > { %v704_v27 = vpop.eup %703 }
 0x22a   : > { %v412_v29 = vmul.f32 %v704_v27, %v700_v20 }
 0x22d   : > { %v706_v28 = vpop.eup %705 }
 0x22e   : > { %v413_v30 = vmul.f32 %v706_v28, %v702_v22 }
 0x230   : > { %v414_v31 = vpack.c.bf16 %v413_v30, %v412_v29 }
 0x232   : > { %652 = vmatmul.mubr.msk.bf16.vlgmr.msra.gmra.mrb[0].mxu1 %vm391_vm2, %v414_v31 }
 0x305   : > { %v458_v32 = vpop.f32.mrb[0].mxu1 }
 0x306   : > { %v637_v33 = vpack.c.bf16 %v458_v32, %v458_v32  ;;  %v653_v34 = vpop.f32.mrb[1].mxu1 }
 0x307   : > { %v461_v35 = vpop.f32.mrb[2].mxu1 }
 0x308   : > { %474 = vst.msk [vmem:[%s319_s19] sm:$0xf] %vm473_vm3, %v637_v33  ;;  %v638_v36 = vpack.c.bf16 %v461_v35, %v461_v35  ;;  %v654_v37 = vpop.f32.mrb[3].mxu1 }
 0x30a   : > { %475 = vst.msk [vmem:[%s319_s19 + $0x4] sm:$0xf] %vm473_vm3, %v638_v36 }
 0x30b PF: > { %s13_s16 = sadd.s32 1, %s745_s16   ;;  %s851_s12 = smov %s737_s14 }
 0x30c   : > { %p10_p9 = scmp.ge.s32.totalorder %s13_s16, 10   ;;  %s852_s13 = smov %s741_s15 }
 0x30d   : > { %s853_s14 = smov %s856_s17  ;;  %s854_s15 = smov %s860_s18 }
 0x30e   :  { %12 = sbr.rel (!%p10_p9) target bundleno = 3 (0x3), region = 68 }

// kernel: dit_forward.23
= control target key start
LH: loop header
LB: loop body
LE: loop exit
PB: predicated region body
PF: predicated region fallthrough
CT: control target
= control target key end

     0   :  { %s766_s18 = smov 0   ;;  %s768_s19 = smov 0   ;;  %s829_s0 = inlined_call_operand.vmem [shape: bf16[2,16,32], index: 0, kind: input, shape index: {}]   ;;  %s830_s1 = inlined_call_operand.vmem [shape: f32[2,1,32], index: 1, kind: input, shape index: {}]   ;;  %s831_s2 = inlined_call_operand.vmem [shape: f32[2,1,32], index: 2, kind: input, shape index: {}]   ;;  %s832_s3 = inlined_call_operand.vmem [shape: bf16[32,128], index: 3, kind: input, shape index: {}]   ;;  %s833_s4 = inlined_call_operand.vmem [shape: f32[1,128], index: 4, kind: input, shape index: {}]   ;;  %s834_s5 = inlined_call_operand.vmem [shape: bf16[2,16,128], index: 5, kind: output, shape index: {}]  }
   0x1   :  { %s770_s20 = smov 0  }
   0x2 LB: > { %s34_s21 = sadd.s32 1, %s728_s19  ;;  %p635_p0 = scmp.ge.s32.totalorder %s732_s20, 1  ;;  %s732_s20 = sphi %s770_s20, %s15_s20   ;;  %s728_s19 = sphi %s768_s19, %s836_s19   ;;  %s724_s18 = sphi %s766_s18, %s835_s18  }
   0x3   : > { %p36_p1 = scmp.ge.s32.totalorder %s34_s21, 2  ;;  %p250_p2 = scmp.lt.s32.totalorder %s732_s20, 3 }
   0x5   : > { %s838_s21 = smov (%p36_p1, %s34_s21), 0  ;;  %p251_p3 = pnand %p635_p0, %p250_p2 }
   0x6   : > { %p303_p4 = scmp.lt.s32.totalorder (!%p251_p3), %s724_s18, 1  ;;  %vm347_vm0 = vcmask (!%p251_p3), 261120   ;;  %v700_v15 = vld [vmem:[%s832_s3] sm:$0xff] (!%p251_p3)   ;;  %v734_v16 = vmov (!%p251_p3), 0.0   ;;  %v701_v17 = vld [vmem:[%s832_s3 + $0x8] sm:$0xff] (!%p251_p3)   ;;  %vm735_vm1 = vmmov (!%p251_p3), 0  }
   0x7   : > { %254 = sbr.rel (%p251_p3) target bundleno = 583 (0x247), region = 40  ;;  %666 = vmatprep.subr.bf16.mxu0 (!%p251_p3), %v734_v16  ;;  %670 = vmatprep.mubr.msk.bf16.mxu0 (!%p251_p3), %vm735_vm1, %v734_v16  ;;  %v642_v36 = vld [vmem:[%s833_s4] ss:$0 sm:$0xff] (!%p251_p3) }
   0x8   : > { %667 = vmatpush3.bf16.msra.mxu0 (!%p251_p3), %v700_v15 }
   0x9   : > { %668 = vmatprep.subr.bf16.mxu0 (!%p251_p3), %v734_v16 }
   0xc   : > { %669 = vmatpush3.bf16.msra.mxu0 (!%p251_p3), %v701_v17 }
   0xe   : > { %s840_s18 = smov (!%p303_p4, %s724_s18), 1 }
   0xf   : > { %s650_s22 = sshll.u32 %s840_s18, 3  ;;  %s314_s7 = scalar_lea.vmem %s830_s1, %s840_s18 }
  0x10   : > { %s310_s25 = scalar_lea.vmem %s829_s0, %s650_s22  ;;  %v640_v26 = vld [vmem:[%s314_s7] ss:$0 sm:$0xff]  ;;  %s317_s10 = scalar_lea.vmem %s831_s2, %s840_s18 }
  0x11   : > { %v655_v0 = vld [vmem:[%s310_s25] sm:$0xff]   ;;  %s336_s15 = scalar_lea.vmem %s834_s5, %s650_s22 }
  0x12   : > { %v656_v1 = vunpack.c.l.bf16 %v655_v0  ;;  %v657_v2 = vunpack.c.h.bf16 %v655_v0  ;;  %v641_v30 = vld [vmem:[%s317_s10] ss:$0 sm:$0xff] }
  0x14   : > { %v348_v3 = vsel %vm347_vm0, %v656_v1, 0.0  ;;  %v351_v4 = vsel %vm347_vm0, %v657_v2, 0.0 }
  0x15   : > { %349 = vadd.xlane.f32.xlu0 %v348_v3 }
  0x19   : > { %352 = vadd.xlane.f32.xlu0 %v351_v4 }
  0xa2   : > { %v350_v5 = vpop.xlane.xlu0 %349 }
  0xa3   : > { %v355_v6 = vmul.f32 0.03125, %v350_v5 }
  0xa5   : > { %v357_v7 = vsub.f32 %v656_v1, %v355_v6 }
  0xa6   : > { %v353_v8 = vpop.xlane.xlu0 %352 }
  0xa7   : > { %v356_v9 = vmul.f32 0.03125, %v353_v8  ;;  %v359_v10 = vmul.f32 %v357_v7, %v357_v7 }
  0xa9   : > { %v358_v11 = vsub.f32 %v657_v2, %v356_v9  ;;  %v361_v12 = vsel %vm347_vm0, %v359_v10, 0.0 }
  0xaa   : > { %362 = vadd.xlane.f32.xlu1 %v361_v12 }
  0xab   : > { %v360_v13 = vmul.f32 %v358_v11, %v358_v11 }
  0xad   : > { %v364_v14 = vsel %vm347_vm0, %v360_v13, 0.0 }
  0xae   : > { %365 = vadd.xlane.f32.xlu1 %v364_v14 }
 0x137   : > { %v363_v18 = vpop.xlane.xlu1 %362 }
 0x138   : > { %v367_v19 = vmul.f32 0.03125, %v363_v18 }
 0x13a   : > { %v369_v20 = vadd.f32 1e-06, %v367_v19 }
 0x13b   : > { %v366_v21 = vpop.xlane.xlu1 %365 }
 0x13c   : > { %702 = vrsqrt.f32 %v369_v20  ;;  %v368_v22 = vmul.f32 0.03125, %v366_v21 }
 0x13e   : > { %v370_v23 = vadd.f32 1e-06, %v368_v22 }
 0x140   : > { %704 = vrsqrt.f32 %v370_v23 }
 0x146   : > { %v703_v24 = vpop.eup %702 }
 0x147   : > { %v373_v25 = vmul.f32 %v703_v24, %v357_v7 }
 0x149   : > { %v383_v28 = vmul.f32 %v640_v26, %v373_v25 }
 0x14a   : > { %v705_v27 = vpop.eup %704 }
 0x14b   : > { %v374_v29 = vmul.f32 %v705_v27, %v358_v11  ;;  %v391_v32 = vadd.f32 %v641_v30, %v383_v28 }
 0x14d   : > { %v384_v31 = vmul.f32 %v640_v26, %v374_v29 }
 0x14f   : > { %v392_v33 = vadd.f32 %v641_v30, %v384_v31 }
 0x151   : > { %v393_v34 = vpack.c.bf16 %v392_v33, %v391_v32 }
 0x153   : > { %394 = vst.msk [vmem:[#allocation2] sm:$0xff] %vm347_vm0, %v393_v34 }
 0x15a   : > { %v395_v35 = vld [vmem:[#allocation2] sm:$0xff] }
 0x15b   : > { %671 = vmatmul.mubr.msk.bf16.vlgmr.msra.gmra.mrb[0].mxu0 %vm347_vm0, %v395_v35 }
 0x22e   : > { %v457_v37 = vpop.f32.mrb[0].mxu0 }
 0x22f   : > { %v458_v38 = vadd.f32 %v642_v36, %v457_v37  ;;  %v672_v39 = vpop.f32.mrb[1].mxu0 }
 0x230   : > { %v460_v40 = vpop.f32.mrb[2].mxu0 }
 0x231   : > { %v466_v41 = vmul.f32 0.70710677, %v458_v38  ;;  %v461_v42 = vadd.f32 %v642_v36, %v460_v40  ;;  %v673_v43 = vpop.f32.mrb[3].mxu0  ;;  %v464_v48 = vmul.f32 0.5, %v458_v38 }
 0x233   : > { %706 = verf.f32 %v466_v41  ;;  %v467_v44 = vmul.f32 0.70710677, %v461_v42  ;;  %v465_v49 = vmul.f32 0.5, %v461_v42 }
 0x235   : > { %708 = verf.f32 %v467_v44 }
 0x23d   : > { %v707_v45 = vpop.eup %706 }
 0x23e   : > { %v470_v46 = vadd.f32 1.0, %v707_v45 }
 0x23f   : > { %v709_v47 = vpop.eup %708 }
 0x240   : > { %v471_v50 = vadd.f32 1.0, %v709_v47  ;;  %v472_v51 = vmul.f32 %v470_v46, %v464_v48 }
 0x242   : > { %v473_v52 = vmul.f32 %v471_v50, %v465_v49 }
 0x244   : > { %v661_v53 = vpack.c.bf16 %v473_v52, %v472_v51 }
 0x246   : > { %662 = vst [vmem:[%s336_s15] sm:$0xff] %v661_v53  }
 0x247 PF: > { %s15_s20 = sadd.s32 1, %s732_s20   ;;  %s835_s18 = smov %s728_s19 }
 0x248   : > { %p12_p5 = scmp.ge.s32.totalorder %s15_s20, 4   ;;  %s836_s19 = smov %s838_s21 }
 0x24a   :  { %14 = sbr.rel (!%p12_p5) target bundleno = 2 (0x2), region = 86 }

// kernel: dit_forward.22
= control target key start
LH: loop header
LB: loop body
LE: loop exit
PB: predicated region body
PF: predicated region fallthrough
CT: control target
= control target key end

     0   :  { %s774_s15 = smov 0   ;;  %s776_s16 = smov 0   ;;  %s848_s0 = inlined_call_operand.vmem [shape: bf16[8,16,8], index: 0, kind: input, shape index: {}]   ;;  %s849_s1 = inlined_call_operand.vmem [shape: bf16[32,32], index: 1, kind: input, shape index: {}]   ;;  %s850_s2 = inlined_call_operand.vmem [shape: f32[1,32], index: 2, kind: input, shape index: {}]   ;;  %s851_s3 = inlined_call_operand.vmem [shape: bf16[2,16,32], index: 3, kind: input, shape index: {}]   ;;  %s852_s4 = inlined_call_operand.vmem [shape: bf16[2,16,32], index: 4, kind: output, shape index: {}]  }
   0x1   :  { %s778_s17 = smov 0   ;;  %s780_s18 = smov 0  }
   0x2   :  { %s782_s19 = smov 0  }
   0x3 LB: > { %s29_s20 = sadd.s32 1, %s736_s17  ;;  %s40_s21 = sadd.s32 1, %s740_s18  ;;  %s744_s19 = sphi %s782_s19, %s14_s19   ;;  %s740_s18 = sphi %s780_s18, %s856_s18   ;;  %s736_s17 = sphi %s778_s17, %s855_s17   ;;  %s732_s16 = sphi %s776_s16, %s854_s16   ;;  %s728_s15 = sphi %s774_s15, %s853_s15  }
   0x4   : > { %p30_p0 = scmp.ge.s32.totalorder %s29_s20, 4  ;;  %p627_p1 = scmp.ge.s32.totalorder %s744_s19, 1 }
   0x5   : > { %p251_p2 = scmp.lt.s32.totalorder %s744_s19, 9 }
   0x6   : > { %s858_s20 = smov (%p30_p0, %s29_s20), 0  ;;  %s860_s21 = smov (!%p30_p0, %s40_s21), %s740_s18 }
   0x7   : > { %p252_p3 = pnand %p627_p1, %p251_p2  ;;  %p42_p4 = scmp.ge.s32.totalorder %s860_s21, 2 }
   0x8   : > { %s628_s22 = sshll.u32 (!%p252_p3), %s732_s16, 2  ;;  %p326_p5 = scmp.lt.s32.totalorder (!%p252_p3), %s728_s15, 3 }
   0x9   : > { %s862_s21 = smov (%p42_p4, %s860_s21), 0  ;;  %255 = sbr.rel (%p252_p3) target bundleno = 263 (0x107), region = 36 }
   0xa   : > { %s313_s23 = sadd.s32 (!%p252_p3), %s728_s15, %s628_s22  ;;  %p337_p7 = scmp.lt.s32.totalorder (!%p252_p3), %s732_s16, 1 }
   0xb   : > { %p315_p6 = scmp.lt.s32.totalorder (!%p252_p3), %s313_s23, 7  ;;  %p636_p8 = scmp.ne.s32.totalorder (!%p252_p3), %s728_s15, 0 }
  0x10   : > { %s327_s24 = scalar_select %p326_p5, %s728_s15, 3 }
  0x11   : > { %s864_s23 = smov (!%p315_p6, %s313_s23), 7  ;;  %s866_s16 = smov (!%p337_p7, %s732_s16), 1 }
  0x12   : > { %s631_s25 = sshll.u32 %s327_s24, 2  ;;  %s645_s26 = sshll.u32 %s864_s23, 3  ;;  %vm367_vm0 = vcmask (!%p636_p8), 261120   ;;  %v746_v0 = vmov (!%p636_p8), 0.0  }
  0x13   : > { %s332_s29 = scalar_lea.vmem %s849_s1, %s631_s25  ;;  %s322_s6 = scalar_lea.vmem %s848_s0, %s645_s26  ;;  %368 = vst.msk [vmem:[#allocation2] sm:$0xff] (!%p636_p8), %vm367_vm0, %v746_v0  ;;  %369 = vst.msk [vmem:[#allocation2 + $0x8] sm:$0xff] (!%p636_p8), %vm367_vm0, %v746_v0 }
  0x14   : > { %s646_s7 = sshll.u32 %s866_s16, 3  ;;  %366 = sbr.rel (%p636_p8) target bundleno = 27 (0x1b), region = 40 }
  0x15   : > { %s818_s10 = scalar_lea.vmem %s851_s3, %s646_s7  ;;  %s823_s13 = scalar_lea.vmem %s852_s4, %s646_s7 }
  0x1b PF: > { %v374_v1 = vld [vmem:[%s332_s29] sm:$0xf]  ;;  %vm384_vm1 = vcmask 1043456   ;;  %v747_v2 = vmov 0.0   ;;  %vm748_vm2 = vmmov 0   ;;  %vm380_vm3 = vcmask 64512  }
  0x1c   : > { %656 = vmatprep.subr.bf16.mxu0 %v747_v2  ;;  %v386_v3 = vsel %vm384_vm1, %v374_v1, 0  ;;  %658 = vmatprep.mubr.msk.bf16.mxu0 %vm748_vm2, %v747_v2  ;;  %v705_v4 = vld [vmem:[%s322_s6] sm:$0xff]   ;;  %vm431_vm4 = vcmask 261120   ;;  %v371_v7 = vld [vmem:[#allocation2 + $0x8] sm:$0xff]  ;;  %p639_p9 = scmp.ne.s32.totalorder %s728_s15, 3 }
  0x1d   : > { %657 = vmatpush3.bf16.msra.mxu0 %v386_v3  ;;  %v370_v5 = vld [vmem:[#allocation2] sm:$0xff]  ;;  %vm463_vm5 = vcmask (!%p639_p9), 257024  }
  0x1e   : > { %v640_v14 = vld [vmem:[%s850_s2] ss:$0 sm:$0xff] (!%p639_p9) }
  0x1f   : > { %v651_v15 = vld [vmem:[%s818_s10] sm:$0xff] (!%p639_p9)  }
  0x20   : > { %659 = vmatmul.mubr.msk.bf16.vlgmr.msra.gmra.mrb[0].mxu0 %vm380_vm3, %v705_v4  ;;  %v652_v17 = vunpack.c.l.bf16 (!%p639_p9), %v651_v15  ;;  %v653_v19 = vunpack.c.h.bf16 (!%p639_p9), %v651_v15 }
  0xf2   : > { %437 = sbr.rel (%p639_p9) target bundleno = 263 (0x107), region = 44 }
  0xf3   : > { %v422_v6 = vpop.f32.mrb[0].mxu0 }
  0xf4   : > { %v429_v8 = vadd.f32 %v422_v6, %v370_v5  ;;  %v660_v9 = vpop.f32.mrb[1].mxu0 }
  0xf5   : > { %v425_v10 = vpop.f32.mrb[2].mxu0 }
  0xf6   : > { %432 = vst.msk [vmem:[#allocation2] sm:$0xff] %vm431_vm4, %v429_v8  ;;  %v430_v11 = vadd.f32 %v425_v10, %v371_v7  ;;  %v661_v12 = vpop.f32.mrb[3].mxu0 }
  0xf8   : > { %433 = vst.msk [vmem:[#allocation2 + $0x8] sm:$0xff] %vm431_vm4, %v430_v11 }
  0xfd   : > { %v438_v13 = vld [vmem:[#allocation2] sm:$0xff] }
  0xfe   : > { %v447_v16 = vadd.f32 %v640_v14, %v438_v13 }
  0xff   : > { %v439_v18 = vld [vmem:[#allocation2 + $0x8] sm:$0xff] }
 0x100   : > { %v448_v20 = vadd.f32 %v640_v14, %v439_v18  ;;  %v453_v21 = vadd.f32 %v652_v17, %v447_v16 }
 0x102   : > { %v454_v22 = vadd.f32 %v653_v19, %v448_v20  ;;  %v648_v23 = vpack.c.bf16 %v453_v21, %v453_v21 }
 0x104   : > { %v649_v24 = vpack.c.bf16 %v454_v22, %v454_v22  ;;  %464 = vst.msk [vmem:[%s823_s13] sm:$0xf] %vm463_vm5, %v648_v23 }
 0x106   : > { %465 = vst.msk [vmem:[%s823_s13 + $0x4] sm:$0xf] %vm463_vm5, %v649_v24 }
 0x107 PF: > { %s14_s19 = sadd.s32 1, %s744_s19   ;;  %s853_s15 = smov %s736_s17 }
 0x108   : > { %p11_p10 = scmp.ge.s32.totalorder %s14_s19, 10   ;;  %s854_s16 = smov %s740_s18 }
 0x109   : > { %s855_s17 = smov %s858_s20  ;;  %s856_s18 = smov %s862_s21 }
 0x10a   :  { %13 = sbr.rel (!%p11_p10) target bundleno = 3 (0x3), region = 83 }

// kernel: dit_forward.24
= control target key start
LH: loop header
LB: loop body
LE: loop exit
PB: predicated region body
PF: predicated region fallthrough
CT: control target
= control target key end

     0   :  { %vm22_vm0 = vcmask 261120   ;;  %v293_v1 = vmov 0.0   ;;  %vm215_vm1 = vcmask 257024   ;;  %s378_s1 = inlined_call_operand.vmem [shape: bf16[128,32], index: 1, kind: input, shape index: {}]   ;;  %s379_s0 = inlined_call_operand.vmem [shape: bf16[32,128], index: 0, kind: input, shape index: {}]   ;;  %s380_s3 = inlined_call_operand.vmem [shape: bf16[32,32], index: 3, kind: input, shape index: {}]   ;;  %s381_s2 = inlined_call_operand.vmem [shape: f32[1,32], index: 2, kind: input, shape index: {}]   ;;  %s382_s4 = inlined_call_operand.vmem [shape: bf16[32,32], index: 4, kind: output, shape index: {}]  }
   0x1   :  { %v283_v0 = vld [vmem:[%s378_s1] sm:$0xff]   ;;  %25 = vst.msk [vmem:[#allocation2 + $0x10] sm:$0xff] %vm22_vm0, %v293_v1  ;;  %23 = vst.msk [vmem:[#allocation2] sm:$0xff] %vm22_vm0, %v293_v1  ;;  %v284_v2 = vld [vmem:[%s378_s1 + $0x8] sm:$0xff]  }
   0x2   :  { %24 = vst.msk [vmem:[#allocation2 + $0x8] sm:$0xff] %vm22_vm0, %v293_v1  ;;  %26 = vst.msk [vmem:[#allocation2 + $0x18] sm:$0xff] %vm22_vm0, %v293_v1  ;;  %262 = vmatprep.subr.bf16.mxu0 %v283_v0  ;;  %v285_v3 = vld [vmem:[%s378_s1 + $0x10] sm:$0xff]   ;;  %v286_v4 = vld [vmem:[%s378_s1 + $0x18] sm:$0xff]  }
   0x3   :  { %263 = vmatpush3.bf16.msra.mxu0 %v283_v0  ;;  %v291_v5 = vld [vmem:[%s379_s0] sm:$0xff]   ;;  %v288_v7 = vld [vmem:[%s378_s1 + $0x28] sm:$0xff]   ;;  %v289_v8 = vld [vmem:[%s378_s1 + $0x30] sm:$0xff]  }
   0x4   :  { %264 = vmatprep.subr.bf16.mxu0 %v284_v2  ;;  %278 = vmatprep.mubr.bf16.mxu0 %v291_v5  ;;  %v287_v6 = vld [vmem:[%s378_s1 + $0x20] sm:$0xff]   ;;  %v290_v9 = vld [vmem:[%s378_s1 + $0x38] sm:$0xff]   ;;  %v292_v10 = vld [vmem:[%s379_s0 + $0x8] sm:$0xff]  }
   0x5   :  { %v251_v23 = vld [vmem:[%s380_s3 + $0x8] sm:$0xff]   ;;  %v244_v24 = vld [vmem:[%s380_s3] sm:$0xff]  }
   0x6   :  { %v234_v25 = vld [vmem:[%s381_s2] ss:$0 sm:$0xff]  ;;  %v249_v26 = vunpack.c.l.bf16 %v251_v23  ;;  %v245_v28 = vunpack.c.l.bf16 %v244_v24  ;;  %v250_v31 = vunpack.c.h.bf16 %v251_v23  ;;  %v246_v34 = vunpack.c.h.bf16 %v244_v24 }
   0x7   :  { %265 = vmatpush3.bf16.msra.mxu0 %v284_v2 }
   0x8   :  { %266 = vmatprep.subr.bf16.mxu0 %v285_v3  ;;  %v29_v11 = vld [vmem:[#allocation2 + $0x10] sm:$0xff]  ;;  %v27_v12 = vld [vmem:[#allocation2] sm:$0xff] }
   0x9   :  { %v30_v14 = vld [vmem:[#allocation2 + $0x18] sm:$0xff]  ;;  %v28_v17 = vld [vmem:[#allocation2 + $0x8] sm:$0xff] }
   0xb   :  { %267 = vmatpush3.bf16.msra.mxu0 %v285_v3 }
   0xc   :  { %268 = vmatprep.subr.bf16.mxu0 %v286_v4 }
   0xf   :  { %269 = vmatpush3.bf16.msra.mxu0 %v286_v4 }
  0x10   :  { %270 = vmatprep.subr.bf16.mxu0 %v287_v6 }
  0x13   :  { %271 = vmatpush3.bf16.msra.mxu0 %v287_v6 }
  0x14   :  { %272 = vmatprep.subr.bf16.mxu0 %v288_v7 }
  0x17   :  { %273 = vmatpush3.bf16.msra.mxu0 %v288_v7 }
  0x18   :  { %274 = vmatprep.subr.bf16.mxu0 %v289_v8 }
  0x1b   :  { %275 = vmatpush3.bf16.msra.mxu0 %v289_v8 }
  0x1c   :  { %276 = vmatprep.subr.bf16.mxu0 %v290_v9 }
  0x1f   :  { %277 = vmatpush3.bf16.msra.mxu0 %v290_v9 }
  0x22   :  { %279 = vmatmul.mubr.bf16.vlgmr.msra.gmra.mrb[0].mxu0 %v292_v10 }
  0xf5   :  { %v280_v13 = vpop.f32.mrb[0].mxu0 }
  0xf6   :  { %v162_v15 = vadd.f32 %v280_v13, %v29_v11  ;;  %v145_v16 = vpop.f32.mrb[1].mxu0 }
  0xf7   :  { %v160_v18 = vadd.f32 %v145_v16, %v27_v12  ;;  %v281_v19 = vpop.f32.mrb[2].mxu0 }
  0xf8   :  { %167 = vst.msk [vmem:[#allocation2 + $0x10] sm:$0xff] %vm22_vm0, %v162_v15  ;;  %v163_v20 = vadd.f32 %v281_v19, %v30_v14  ;;  %v148_v21 = vpop.f32.mrb[3].mxu0 }
  0xf9   :  { %165 = vst.msk [vmem:[#allocation2] sm:$0xff] %vm22_vm0, %v160_v18  ;;  %v161_v22 = vadd.f32 %v148_v21, %v28_v17 }
  0xfa   :  { %168 = vst.msk [vmem:[#allocation2 + $0x18] sm:$0xff] %vm22_vm0, %v163_v20 }
  0xfb   :  { %166 = vst.msk [vmem:[#allocation2 + $0x8] sm:$0xff] %vm22_vm0, %v161_v22 }
  0xff   :  { %v174_v27 = vld [vmem:[#allocation2 + $0x10] sm:$0xff] }
 0x100   :  { %v185_v29 = vadd.f32 %v234_v25, %v174_v27  ;;  %v172_v30 = vld [vmem:[#allocation2] sm:$0xff] }
 0x101   :  { %v183_v32 = vadd.f32 %v234_v25, %v172_v30  ;;  %v175_v33 = vld [vmem:[#allocation2 + $0x18] sm:$0xff] }
 0x102   :  { %v197_v35 = vadd.f32 %v249_v26, %v185_v29  ;;  %v186_v36 = vadd.f32 %v234_v25, %v175_v33  ;;  %v173_v37 = vld [vmem:[#allocation2 + $0x8] sm:$0xff] }
 0x103   :  { %v195_v38 = vadd.f32 %v245_v28, %v183_v32  ;;  %v184_v39 = vadd.f32 %v234_v25, %v173_v37 }
 0x104   :  { %v241_v40 = vpack.c.bf16 %v197_v35, %v197_v35  ;;  %v198_v41 = vadd.f32 %v250_v31, %v186_v36 }
 0x105   :  { %v239_v42 = vpack.c.bf16 %v195_v38, %v195_v38  ;;  %v196_v43 = vadd.f32 %v246_v34, %v184_v39 }
 0x106   :  { %218 = vst.msk [vmem:[%s382_s4 + $0x8] sm:$0xf] %vm215_vm1, %v241_v40  ;;  %v242_v44 = vpack.c.bf16 %v198_v41, %v198_v41 }
 0x107   :  { %216 = vst.msk [vmem:[%s382_s4] sm:$0xf] %vm215_vm1, %v239_v42  ;;  %v240_v45 = vpack.c.bf16 %v196_v43, %v196_v43 }
 0x108   :  { %219 = vst.msk [vmem:[%s382_s4 + $0xc] sm:$0xf] %vm215_vm1, %v242_v44 }
 0x109   :  { %217 = vst.msk [vmem:[%s382_s4 + $0x4] sm:$0xf] %vm215_vm1, %v240_v45 }

// kernel: dit_forward.31
= control target key start
LH: loop header
LB: loop body
LE: loop exit
PB: predicated region body
PF: predicated region fallthrough
CT: control target
= control target key end

     0   :  { %s735_s18 = smov 0   ;;  %s737_s19 = smov 0   ;;  %s797_s0 = inlined_call_operand.vmem [shape: bf16[2,16,32], index: 0, kind: input, shape index: {}]   ;;  %s798_s1 = inlined_call_operand.vmem [shape: f32[2,1,32], index: 1, kind: input, shape index: {}]   ;;  %s799_s2 = inlined_call_operand.vmem [shape: f32[2,1,32], index: 2, kind: input, shape index: {}]   ;;  %s800_s3 = inlined_call_operand.vmem [shape: bf16[32,32], index: 3, kind: input, shape index: {}]   ;;  %s801_s4 = inlined_call_operand.vmem [shape: f32[1,32], index: 4, kind: input, shape index: {}]   ;;  %s802_s5 = inlined_call_operand.vmem [shape: f32[2,16,32], index: 5, kind: output, shape index: {}]  }
   0x1   :  { %s739_s20 = smov 0  }
   0x2 LB: > { %s34_s21 = sadd.s32 1, %s697_s19  ;;  %p617_p0 = scmp.ge.s32.totalorder %s701_s20, 1  ;;  %s701_s20 = sphi %s739_s20, %s15_s20   ;;  %s697_s19 = sphi %s737_s19, %s804_s19   ;;  %s693_s18 = sphi %s735_s18, %s803_s18  }
   0x3   : > { %p36_p1 = scmp.ge.s32.totalorder %s34_s21, 2  ;;  %p250_p2 = scmp.lt.s32.totalorder %s701_s20, 3 }
   0x5   : > { %s806_s21 = smov (%p36_p1, %s34_s21), 0  ;;  %p251_p3 = pnand %p617_p0, %p250_p2 }
   0x6   : > { %p303_p4 = scmp.lt.s32.totalorder (!%p251_p3), %s693_s18, 1  ;;  %vm347_vm0 = vcmask (!%p251_p3), 261120   ;;  %v673_v15 = vld [vmem:[%s800_s3] sm:$0xff] (!%p251_p3)   ;;  %v703_v16 = vmov (!%p251_p3), 0.0   ;;  %v674_v17 = vld [vmem:[%s800_s3 + $0x8] sm:$0xff] (!%p251_p3)   ;;  %vm704_vm1 = vmmov (!%p251_p3), 0  }
   0x7   : > { %254 = sbr.rel (%p251_p3) target bundleno = 564 (0x234), region = 40  ;;  %639 = vmatprep.subr.bf16.mxu0 (!%p251_p3), %v703_v16  ;;  %643 = vmatprep.mubr.msk.bf16.mxu0 (!%p251_p3), %vm704_vm1, %v703_v16  ;;  %v624_v36 = vld [vmem:[%s801_s4] ss:$0 sm:$0xff] (!%p251_p3) }
   0x8   : > { %640 = vmatpush3.bf16.msra.mxu0 (!%p251_p3), %v673_v15 }
   0x9   : > { %641 = vmatprep.subr.bf16.mxu0 (!%p251_p3), %v703_v16 }
   0xc   : > { %642 = vmatpush3.bf16.msra.mxu0 (!%p251_p3), %v674_v17 }
   0xe   : > { %s808_s18 = smov (!%p303_p4, %s693_s18), 1 }
   0xf   : > { %s630_s22 = sshll.u32 %s808_s18, 3  ;;  %s314_s7 = scalar_lea.vmem %s798_s1, %s808_s18 }
  0x10   : > { %s310_s25 = scalar_lea.vmem %s797_s0, %s630_s22  ;;  %v622_v26 = vld [vmem:[%s314_s7] ss:$0 sm:$0xff]  ;;  %s317_s10 = scalar_lea.vmem %s799_s2, %s808_s18 }
  0x11   : > { %v633_v0 = vld [vmem:[%s310_s25] sm:$0xff]   ;;  %s631_s11 = sshll.u32 %s808_s18, 4 }
  0x12   : > { %v634_v1 = vunpack.c.l.bf16 %v633_v0  ;;  %v635_v2 = vunpack.c.h.bf16 %v633_v0  ;;  %v623_v30 = vld [vmem:[%s317_s10] ss:$0 sm:$0xff]  ;;  %s336_s16 = scalar_lea.vmem %s802_s5, %s631_s11 }
  0x14   : > { %v348_v3 = vsel %vm347_vm0, %v634_v1, 0.0  ;;  %v351_v4 = vsel %vm347_vm0, %v635_v2, 0.0 }
  0x15   : > { %349 = vadd.xlane.f32.xlu0 %v348_v3 }
  0x19   : > { %352 = vadd.xlane.f32.xlu0 %v351_v4 }
  0xa2   : > { %v350_v5 = vpop.xlane.xlu0 %349 }
  0xa3   : > { %v355_v6 = vmul.f32 0.03125, %v350_v5 }
  0xa5   : > { %v357_v7 = vsub.f32 %v634_v1, %v355_v6 }
  0xa6   : > { %v353_v8 = vpop.xlane.xlu0 %352 }
  0xa7   : > { %v356_v9 = vmul.f32 0.03125, %v353_v8  ;;  %v359_v10 = vmul.f32 %v357_v7, %v357_v7 }
  0xa9   : > { %v358_v11 = vsub.f32 %v635_v2, %v356_v9  ;;  %v361_v12 = vsel %vm347_vm0, %v359_v10, 0.0 }
  0xaa   : > { %362 = vadd.xlane.f32.xlu1 %v361_v12 }
  0xab   : > { %v360_v13 = vmul.f32 %v358_v11, %v358_v11 }
  0xad   : > { %v364_v14 = vsel %vm347_vm0, %v360_v13, 0.0 }
  0xae   : > { %365 = vadd.xlane.f32.xlu1 %v364_v14 }
 0x137   : > { %v363_v18 = vpop.xlane.xlu1 %362 }
 0x138   : > { %v367_v19 = vmul.f32 0.03125, %v363_v18 }
 0x13a   : > { %v369_v20 = vadd.f32 1e-05, %v367_v19 }
 0x13b   : > { %v366_v21 = vpop.xlane.xlu1 %365 }
 0x13c   : > { %675 = vrsqrt.f32 %v369_v20  ;;  %v368_v22 = vmul.f32 0.03125, %v366_v21 }
 0x13e   : > { %v370_v23 = vadd.f32 1e-05, %v368_v22 }
 0x140   : > { %677 = vrsqrt.f32 %v370_v23 }
 0x146   : > { %v676_v24 = vpop.eup %675 }
 0x147   : > { %v373_v25 = vmul.f32 %v676_v24, %v357_v7 }
 0x149   : > { %v383_v28 = vmul.f32 %v622_v26, %v373_v25 }
 0x14a   : > { %v678_v27 = vpop.eup %677 }
 0x14b   : > { %v374_v29 = vmul.f32 %v678_v27, %v358_v11  ;;  %v391_v32 = vadd.f32 %v623_v30, %v383_v28 }
 0x14d   : > { %v384_v31 = vmul.f32 %v622_v26, %v374_v29 }
 0x14f   : > { %v392_v33 = vadd.f32 %v623_v30, %v384_v31 }
 0x151   : > { %v393_v34 = vpack.c.bf16 %v392_v33, %v391_v32 }
 0x153   : > { %394 = vst.msk [vmem:[#allocation2] sm:$0xff] %vm347_vm0, %v393_v34 }
 0x15a   : > { %v395_v35 = vld [vmem:[#allocation2] sm:$0xff] }
 0x15b   : > { %644 = vmatmul.mubr.msk.bf16.vlgmr.msra.gmra.mrb[0].mxu0 %vm347_vm0, %v395_v35 }
 0x22e   : > { %v457_v37 = vpop.f32.mrb[0].mxu0 }
 0x22f   : > { %v458_v38 = vadd.f32 %v624_v36, %v457_v37  ;;  %v645_v39 = vpop.f32.mrb[1].mxu0 }
 0x230   : > { %v460_v40 = vpop.f32.mrb[2].mxu0 }
 0x231   : > { %464 = vst.msk [vmem:[%s336_s16] sm:$0xff] %vm347_vm0, %v458_v38  ;;  %v461_v41 = vadd.f32 %v624_v36, %v460_v40  ;;  %v646_v42 = vpop.f32.mrb[3].mxu0 }
 0x233   : > { %465 = vst.msk [vmem:[%s336_s16 + $0x8] sm:$0xff] %vm347_vm0, %v461_v41 }
 0x234 PF: > { %s15_s20 = sadd.s32 1, %s701_s20   ;;  %s803_s18 = smov %s697_s19 }
 0x235   : > { %p12_p5 = scmp.ge.s32.totalorder %s15_s20, 4   ;;  %s804_s19 = smov %s806_s21 }
 0x237   :  { %14 = sbr.rel (!%p12_p5) target bundleno = 2 (0x2), region = 86 }

</bundles_post_ra>
